<compile_context>
chip_gen: v5e
topology: v5e:2x2
jax: 0.10.0
libtpu: 0.0.40
codegen_flags: <defaults>
</compile_context>

<pallas_src>
import functools

import jax
import jax.numpy as jnp
from jax.experimental import pallas as pl
from jax.experimental.pallas import tpu as pltpu


def _phase(idx, period):
    """idx % period for a static period (bitwise AND when period is 2**k)."""
    if period & (period - 1) == 0:
        return jnp.bitwise_and(idx, period - 1)
    return jax.lax.rem(idx, jnp.int32(period))


def _fused_malis_loss_kernel(pred_ref, targ_ref, out_ref, *, win, beta, dmax,
                             n_cap, p_cap, inv_e, rows_valid, cols_valid):
    """pred/targ: (1, th, W) tiles -> out: (1, 1, 1, W) row-partial loss sums."""
    th, W = pred_ref.shape[1], pred_ref.shape[2]

    p = pred_ref[0].astype(jnp.float32)          # (th, W), cast in-kernel
    t = targ_ref[0].astype(jnp.float32)

    row = jax.lax.broadcasted_iota(jnp.int32, (th, W), 0)
    col = jax.lax.broadcasted_iota(jnp.int32, (th, W), 1)
    grow = row + pl.program_id(1) * th           # global row index of this tile
    row_ok = grow < rows_valid                   # inside processed full windows
    col_ok = col < cols_valid
    in_win_h = _phase(col, win) < (win - 1)      # not the last column of a window
    in_win_v = _phase(row, win) < (win - 1)      # not the last row of a window
    valid_h = row_ok & col_ok & in_win_h
    valid_v = row_ok & col_ok & in_win_v

    # Neighbour values via XLU rolls (wrap-around only lands on masked edges,
    # and tiles are window-aligned so no halo is needed).
    t_right = pltpu.roll(t, shift=W - 1, axis=1)   # t[r, c + 1]
    t_down = pltpu.roll(t, shift=th - 1, axis=0)   # t[r + 1, c]

    n_cap_f = jnp.float32(n_cap)
    gtc_h = jnp.minimum(t + t_right, n_cap_f)      # capped GT edge costs
    gtc_v = jnp.minimum(t + t_down, n_cap_f)

    # TODO(synk): true MALIS maximin pair counting is not expressible in Pallas;
    # deterministic normalized uniform edge weights are used, then the
    # reference's exact post-masking is applied.
    one = jnp.float32(inv_e)
    zero = jnp.float32(0.0)
    ewn_h = jnp.where(valid_h & (gtc_h < p_cap), one, zero)
    ewn_v = jnp.where(valid_v & (gtc_v < p_cap), one, zero)
    ewp_h = jnp.where(valid_h & (gtc_h >= n_cap), one, zero)
    ewp_v = jnp.where(valid_v & (gtc_v >= n_cap), one, zero)

    # Edge -> node scatter: node[r,c] = h[r,c] + h[r,c-1] + v[r,c] + v[r-1,c]
    w_n = (ewn_h + pltpu.roll(ewn_h, shift=1, axis=1)
           + ewn_v + pltpu.roll(ewn_v, shift=1, axis=0))
    w_p = (ewp_h + pltpu.roll(ewp_h, shift=1, axis=1)
           + ewp_v + pltpu.roll(ewp_v, shift=1, axis=0))

    d = jnp.float32(dmax) - p
    contrib = (p * p) * w_n + jnp.float32(beta) * (d * d) * w_p
    # Sublane-only reduction -> lane-dense (1, W) partial-sum store.
    out_ref[0, 0] = jnp.sum(contrib, axis=0, keepdims=True)


def malis_window_poss_loss(pred, target, *, beta=0.1, dmax=20,
                           costs_n_cap=10.0, costs_p_cap=3.0, window=64):
    B, C, H, W = pred.shape
    assert C == 1, "reference implementation assumes a single channel"
    win = int(window) if window else int(W)
    K, J = H // win, W // win
    if K == 0 or J == 0 or win < 2:
        # No full window fits (or degenerate window): all weights are zero.
        return jnp.float32(0.0)

    pred2 = pred.reshape(B, H, W)      # free: C == 1, native dtype kept
    targ2 = target.reshape(B, H, W)

    # Row-tile size: a multiple of the window (no edge crosses a tile), a
    # multiple of 8 sublanes, sized to keep the per-input f32 tile ~1 MiB.
    tile_budget = 1 << 20
    if H * W * 4 <= 2 * tile_budget:
        th, n_h = H, 1                               # whole image per batch fits
    else:
        max_g = max(1, tile_budget // (4 * W * win))
        g = 0
        for cand in range(min(K, max_g), 0, -1):
            if K % cand == 0 and (cand * win) % 8 == 0:
                g = cand
                break
        if g == 0:
            th, n_h = H, 1                           # layout-unfriendly window
        else:
            th, n_h = g * win, K // g                # covers exactly rows [0, K*win)

    tile_f32 = th * W * 4
    vmem_limit = int(max(32 * 1024 * 1024, min(48 * 1024 * 1024, 20 * tile_f32)))
    in_bytes = (pred2.size * pred2.dtype.itemsize
                + targ2.size * targ2.dtype.itemsize)
    cost = pl.CostEstimate(flops=40 * B * H * W, transcendentals=0,
                           bytes_accessed=in_bytes + B * n_h * W * 4)

    kernel = functools.partial(
        _fused_malis_loss_kernel, win=win, beta=float(beta), dmax=float(dmax),
        n_cap=float(costs_n_cap), p_cap=float(costs_p_cap),
        inv_e=1.0 / float(2 * win * (win - 1)),      # uniform surrogate weight
        rows_valid=K * win, cols_valid=J * win)

    partials = pl.pallas_call(
        kernel,
        out_shape=jax.ShapeDtypeStruct((B, n_h, 1, W), jnp.float32),
        grid_spec=pltpu.PrefetchScalarGridSpec(
            num_scalar_prefetch=0,
            grid=(B, n_h),
            in_specs=[pl.BlockSpec((1, th, W), lambda b, i: (b, i, 0)),
                      pl.BlockSpec((1, th, W), lambda b, i: (b, i, 0))],
            out_specs=pl.BlockSpec((1, 1, 1, W), lambda b, i: (b, i, 0, 0))),
        compiler_params=pltpu.CompilerParams(
            dimension_semantics=("parallel", "parallel"),
            vmem_limit_bytes=vmem_limit),
        cost_estimate=cost,
    )(pred2, targ2)

    return jnp.sum(partials)


if __name__ == "__main__":
    key = jax.random.PRNGKey(0)
    k1, k2 = jax.random.split(key)
    # Module default window=64 implies spatial >= 64; 128x128 gives a 2x2 window
    # grid while staying tiny (2 x 1 x 128 x 128 f32 = 128 KiB per input).
    B, C, H, W = 2, 1, 128, 128
    pred = jax.random.normal(k1, (B, C, H, W), dtype=jnp.float32) * 2.0 + 5.0
    target = jax.random.uniform(k2, (B, C, H, W), dtype=jnp.float32,
                                minval=0.0, maxval=8.0)

    loss = malis_window_poss_loss(pred, target, beta=0.1, dmax=20,
                                  costs_n_cap=10.0, costs_p_cap=3.0, window=64)
    loss = jax.block_until_ready(loss)
    assert loss.shape == () and bool(jnp.isfinite(loss))
    print("KERNEL_OK")
</pallas_src>

<mosaic_0001>
module attributes {stable_mosaic.version = 11 : i64} {
  func.func @_fused_malis_loss_kernel(%arg0: i32, %arg1: i32, %arg2: memref<1x128x128xf32, #tpu.memory_space<vmem>>, %arg3: memref<1x128x128xf32, #tpu.memory_space<vmem>>, %arg4: memref<1x1x1x128xf32, #tpu.memory_space<vmem>>) attributes {dimension_semantics = [#tpu.dimension_semantics<parallel>, #tpu.dimension_semantics<parallel>], iteration_bounds = array<i64: 2, 1>, scalar_prefetch = 0 : i64, scratch_operands = 0 : i64, tpu.core_type = #tpu.core_type<tc>, window_params = [{transform_indices = @transform_0, window_bounds = array<i64: 1, 128, 128>}, {transform_indices = @transform_1, window_bounds = array<i64: 1, 128, 128>}, {transform_indices = @transform_2, window_bounds = array<i64: 1, 1, 1, 128>}]} {
    %c0 = arith.constant 0 : index
    %c0_0 = arith.constant 0 : index
    %c0_1 = arith.constant 0 : index
    %0 = vector.load %arg2[%c0, %c0_0, %c0_1] : memref<1x128x128xf32, #tpu.memory_space<vmem>>, vector<1x128x128xf32>
    %1 = vector.shape_cast %0 : vector<1x128x128xf32> to vector<128x128xf32>
    %c0_2 = arith.constant 0 : index
    %c0_3 = arith.constant 0 : index
    %c0_4 = arith.constant 0 : index
    %2 = vector.load %arg3[%c0_2, %c0_3, %c0_4] : memref<1x128x128xf32, #tpu.memory_space<vmem>>, vector<1x128x128xf32>
    %3 = vector.shape_cast %2 : vector<1x128x128xf32> to vector<128x128xf32>
    %4 = tpu.iota {dimensions = array<i32: 0>} : vector<128x128xi32>
    %5 = tpu.iota {dimensions = array<i32: 1>} : vector<128x128xi32>
    %c128_i32 = arith.constant 128 : i32
    %6 = arith.muli %arg1, %c128_i32 : i32
    %7 = vector.broadcast %6 : i32 to vector<128x128xi32>
    %8 = arith.addi %4, %7 : vector<128x128xi32>
    %c128_i32_5 = arith.constant 128 : i32
    %9 = vector.broadcast %c128_i32_5 : i32 to vector<128x128xi32>
    %10 = arith.cmpi slt, %8, %9 : vector<128x128xi32>
    %c128_i32_6 = arith.constant 128 : i32
    %11 = vector.broadcast %c128_i32_6 : i32 to vector<128x128xi32>
    %12 = arith.cmpi slt, %5, %11 : vector<128x128xi32>
    %c63_i32 = arith.constant 63 : i32
    %13 = vector.broadcast %c63_i32 : i32 to vector<128x128xi32>
    %14 = arith.andi %5, %13 : vector<128x128xi32>
    %c63_i32_7 = arith.constant 63 : i32
    %15 = vector.broadcast %c63_i32_7 : i32 to vector<128x128xi32>
    %16 = arith.cmpi slt, %14, %15 : vector<128x128xi32>
    %c63_i32_8 = arith.constant 63 : i32
    %17 = vector.broadcast %c63_i32_8 : i32 to vector<128x128xi32>
    %18 = arith.andi %4, %17 : vector<128x128xi32>
    %c63_i32_9 = arith.constant 63 : i32
    %19 = vector.broadcast %c63_i32_9 : i32 to vector<128x128xi32>
    %20 = arith.cmpi slt, %18, %19 : vector<128x128xi32>
    %21 = arith.andi %10, %12 : vector<128x128xi1>
    %22 = arith.andi %21, %16 : vector<128x128xi1>
    %23 = arith.andi %10, %12 : vector<128x128xi1>
    %24 = arith.andi %23, %20 : vector<128x128xi1>
    %c127_i32 = arith.constant 127 : i32
    %25 = tpu.dynamic_rotate %3 by %c127_i32 dim 1 : vector<128x128xf32>, i32 -> vector<128x128xf32>
    %c127_i32_10 = arith.constant 127 : i32
    %26 = tpu.dynamic_rotate %3 by %c127_i32_10 dim 0 : vector<128x128xf32>, i32 -> vector<128x128xf32>
    %27 = arith.addf %3, %25 : vector<128x128xf32>
    %cst = arith.constant 1.000000e+01 : f32
    %28 = vector.broadcast %cst : f32 to vector<128x128xf32>
    %29 = arith.minimumf %27, %28 : vector<128x128xf32>
    %30 = arith.addf %3, %26 : vector<128x128xf32>
    %cst_11 = arith.constant 1.000000e+01 : f32
    %31 = vector.broadcast %cst_11 : f32 to vector<128x128xf32>
    %32 = arith.minimumf %30, %31 : vector<128x128xf32>
    %cst_12 = arith.constant 3.000000e+00 : f32
    %33 = vector.broadcast %cst_12 : f32 to vector<128x128xf32>
    %34 = arith.cmpf olt, %29, %33 : vector<128x128xf32>
    %35 = arith.andi %22, %34 : vector<128x128xi1>
    %cst_13 = arith.constant 1.24007944E-4 : f32
    %cst_14 = arith.constant 0.000000e+00 : f32
    %36 = vector.broadcast %cst_13 : f32 to vector<128x128xf32>
    %37 = vector.broadcast %cst_14 : f32 to vector<128x128xf32>
    %38 = arith.select %35, %36, %37 : vector<128x128xi1>, vector<128x128xf32>
    %cst_15 = arith.constant 3.000000e+00 : f32
    %39 = vector.broadcast %cst_15 : f32 to vector<128x128xf32>
    %40 = arith.cmpf olt, %32, %39 : vector<128x128xf32>
    %41 = arith.andi %24, %40 : vector<128x128xi1>
    %cst_16 = arith.constant 1.24007944E-4 : f32
    %cst_17 = arith.constant 0.000000e+00 : f32
    %42 = vector.broadcast %cst_16 : f32 to vector<128x128xf32>
    %43 = vector.broadcast %cst_17 : f32 to vector<128x128xf32>
    %44 = arith.select %41, %42, %43 : vector<128x128xi1>, vector<128x128xf32>
    %cst_18 = arith.constant 1.000000e+01 : f32
    %45 = vector.broadcast %cst_18 : f32 to vector<128x128xf32>
    %46 = arith.cmpf oge, %29, %45 : vector<128x128xf32>
    %47 = arith.andi %22, %46 : vector<128x128xi1>
    %cst_19 = arith.constant 1.24007944E-4 : f32
    %cst_20 = arith.constant 0.000000e+00 : f32
    %48 = vector.broadcast %cst_19 : f32 to vector<128x128xf32>
    %49 = vector.broadcast %cst_20 : f32 to vector<128x128xf32>
    %50 = arith.select %47, %48, %49 : vector<128x128xi1>, vector<128x128xf32>
    %cst_21 = arith.constant 1.000000e+01 : f32
    %51 = vector.broadcast %cst_21 : f32 to vector<128x128xf32>
    %52 = arith.cmpf oge, %32, %51 : vector<128x128xf32>
    %53 = arith.andi %24, %52 : vector<128x128xi1>
    %cst_22 = arith.constant 1.24007944E-4 : f32
    %cst_23 = arith.constant 0.000000e+00 : f32
    %54 = vector.broadcast %cst_22 : f32 to vector<128x128xf32>
    %55 = vector.broadcast %cst_23 : f32 to vector<128x128xf32>
    %56 = arith.select %53, %54, %55 : vector<128x128xi1>, vector<128x128xf32>
    %c1_i32 = arith.constant 1 : i32
    %57 = tpu.dynamic_rotate %38 by %c1_i32 dim 1 : vector<128x128xf32>, i32 -> vector<128x128xf32>
    %58 = arith.addf %38, %57 : vector<128x128xf32>
    %59 = arith.addf %58, %44 : vector<128x128xf32>
    %c1_i32_24 = arith.constant 1 : i32
    %60 = tpu.dynamic_rotate %44 by %c1_i32_24 dim 0 : vector<128x128xf32>, i32 -> vector<128x128xf32>
    %61 = arith.addf %59, %60 : vector<128x128xf32>
    %c1_i32_25 = arith.constant 1 : i32
    %62 = tpu.dynamic_rotate %50 by %c1_i32_25 dim 1 : vector<128x128xf32>, i32 -> vector<128x128xf32>
    %63 = arith.addf %50, %62 : vector<128x128xf32>
    %64 = arith.addf %63, %56 : vector<128x128xf32>
    %c1_i32_26 = arith.constant 1 : i32
    %65 = tpu.dynamic_rotate %56 by %c1_i32_26 dim 0 : vector<128x128xf32>, i32 -> vector<128x128xf32>
    %66 = arith.addf %64, %65 : vector<128x128xf32>
    %cst_27 = arith.constant 2.000000e+01 : f32
    %67 = vector.broadcast %cst_27 : f32 to vector<128x128xf32>
    %68 = arith.subf %67, %1 : vector<128x128xf32>
    %69 = arith.mulf %1, %1 : vector<128x128xf32>
    %70 = arith.mulf %69, %61 : vector<128x128xf32>
    %71 = arith.mulf %68, %68 : vector<128x128xf32>
    %cst_28 = arith.constant 1.000000e-01 : f32
    %72 = vector.broadcast %cst_28 : f32 to vector<128x128xf32>
    %73 = arith.mulf %72, %71 : vector<128x128xf32>
    %74 = arith.mulf %73, %66 : vector<128x128xf32>
    %75 = arith.addf %70, %74 : vector<128x128xf32>
    %cst_29 = arith.constant dense<0.000000e+00> : vector<128xf32>
    %76 = vector.multi_reduction <add>, %75, %cst_29 [0] : vector<128x128xf32> to vector<128xf32>
    %77 = vector.shape_cast %76 : vector<128xf32> to vector<1x128xf32>
    %c0_30 = arith.constant 0 : index
    %c0_31 = arith.constant 0 : index
    %c0_32 = arith.constant 0 : index
    %c0_33 = arith.constant 0 : index
    %78 = vector.load %arg4[%c0_30, %c0_31, %c0_32, %c0_33] : memref<1x1x1x128xf32, #tpu.memory_space<vmem>>, vector<1x1x1x128xf32>
    %79 = vector.shape_cast %78 : vector<1x1x1x128xf32> to vector<1x128xf32>
    %80 = vector.shape_cast %77 : vector<1x128xf32> to vector<1x1x1x128xf32>
    tpu.vector_store %arg4[%c0_30, %c0_31, %c0_32, %c0_33], %80 {strides = array<i32>} : memref<1x1x1x128xf32, #tpu.memory_space<vmem>>, vector<1x1x1x128xf32>,
    return
  }
  func.func @transform_0(%arg0: i32, %arg1: i32) -> (i32, i32, i32) {
    %c0_i32 = arith.constant 0 : i32
    %c0_i32_0 = arith.constant 0 : i32
    return %arg0, %arg1, %c0_i32 : i32, i32, i32
  }
  func.func @transform_1(%arg0: i32, %arg1: i32) -> (i32, i32, i32) {
    %c0_i32 = arith.constant 0 : i32
    %c0_i32_0 = arith.constant 0 : i32
    return %arg0, %arg1, %c0_i32 : i32, i32, i32
  }
  func.func @transform_2(%arg0: i32, %arg1: i32) -> (i32, i32, i32, i32) {
    %c0_i32 = arith.constant 0 : i32
    %c0_i32_0 = arith.constant 0 : i32
    %c0_i32_1 = arith.constant 0 : i32
    return %arg0, %arg1, %c0_i32, %c0_i32_0 : i32, i32, i32, i32
  }
}

</mosaic_0001>

<bundles_post_ra>
// kernel: tpu_custom_call.1
= control target key start
LH: loop header
LB: loop body
LE: loop exit
PB: predicated region body
PF: predicated region fallthrough
CT: control target
= control target key end

     0   :  { %7 = vsyncpa [#allocation3], 0  ;;  %s2746_s0 = inlined_call_operand.hbm [shape: f32[2,128,128], index: 0, kind: input, shape index: {}]   ;;  %s2747_s1 = inlined_call_operand.hbm [shape: f32[2,128,128], index: 1, kind: input, shape index: {}]   ;;  %s2748_s2 = inlined_call_operand.hbm [shape: f32[2,1,1,128], index: 2, kind: output, shape index: {}]  }
   0x1   :  { %9 = vsyncpa [#allocation3 + $0x1], 0 }
   0x2   :  { %10 = vsyncpa [#allocation6], 0 }
   0x3   :  { %12 = vsyncpa [#allocation6 + $0x1], 0 }
   0x4   :  { %13 = vsyncpa [#allocation4], 0 }
   0x5   :  { %15 = vsyncpa [#allocation4 + $0x1], 0  ;;  %s1452_s9 = smov 0   ;;  %s1454_s10 = smov 0  }
   0x6   :  { %s1456_s11 = smov 0   ;;  %s1458_s12 = smov 0  }
   0x7   :  { %s1460_s13 = smov 0   ;;  %s1462_s14 = smov 0  }
   0x8 LB: > { %s1195_s15 = sadd.s32 4294967295, %s1430_s14   ;;  %s1196_s16 = sadd.s32 4294967294, %s1430_s14   ;;  %s1430_s14 = sphi %s1462_s14, %s21_s14   ;;  %s1426_s13 = sphi %s1460_s13, %s2972_s13   ;;  %s1422_s12 = sphi %s1458_s12, %s2971_s12   ;;  %s1418_s11 = sphi %s1456_s11, %s2970_s11   ;;  %s1414_s10 = sphi %s1454_s10, %s2969_s10   ;;  %s1410_s9 = sphi %s1452_s9, %s2968_s9  }
   0x9   : > { %s33_s17 = sadd.s32 1, %s1426_s13  ;;  %s42_s18 = sadd.s32 1, %s1418_s11 }
   0xa   : > { %p35_p0 = scmp.ge.s32.totalorder %s33_s17, 2  ;;  %p49_p1 = scmp.ne.s32.totalorder %s1418_s11, %s1414_s10 }
   0xb   : > { %p50_p2 = scmp.eq.s32.totalorder %s1430_s14, 0  ;;  %p55_p3 = scmp.ne.s32.totalorder %s1414_s10, %s1410_s9 }
   0xc   : > { %s2974_s17 = smov (%p35_p0, %s33_s17), 0  ;;  %p56_p5 = scmp.eq.s32.totalorder %s1195_s15, 0 }
   0xd   : > { %p1493_p4 = por %p50_p2, %p49_p1  ;;  %s37_s20 = ssub.s32 %s1426_s13, %s2974_s17 }
   0xe   : > { %p109_p6 = scmp.eq.s32.totalorder %s1195_s15, 1  ;;  %p40_p7 = scmp.eq.s32.totalorder %s37_s20, 0 }
   0xf   : > { %p1499_p8 = por %p56_p5, %p55_p3  ;;  %p115_p10 = scmp.eq.s32.totalorder %s1196_s16, 1 }
  0x10   : > { %p1503_p9 = por %p109_p6, %p49_p1  ;;  %p1198_p12 = scmp.ge.s32.totalorder %s1430_s14, 2 }
  0x11   : > { %s1508_s23 = scalar_select %p40_p7, %s1418_s11, %s42_s18  }
  0x12   : > { %p1510_p11 = por %p115_p10, %p55_p3  ;;  %p1229_p13 = scmp.lt.s32.totalorder %s1430_s14, 2 }
  0x13   : > { %s1517_s25 = sand.u32 1, %s1418_s11   ;;  %s1210_s27 = sshll.u32 %s1426_s13, 7 }
  0x14   : > { %s1199_s26 = sshll.u32 %s1517_s25, 7  ;;  %s146_s30 = scalar_lea.hbm %s2746_s0, %s1210_s27 }
  0x15   : > { %s139_s3 = scalar_lea.vmem [#allocation2], %s1199_s26  ;;  %s147_s5 = sshll.u32 %s146_s30, 4  ;;  %s148_s5 = int_to_ptr.hbm [resolvable:$true] %s147_s5 }
  0x16   : > { %s149_s4 = sshll.u32 %s139_s3, 4  ;;  %p1526_p0 = pnand %p1229_p13, %p1493_p4  ;;  %s150_s4 = int_to_ptr.vmem [resolvable:$true] %s149_s4 }
  0x17   : > { %p1205_p1 = scmp.ge.s32.totalorder %s1430_s14, 1  ;;  %s136_s7 = scalar_lea.sflag [#allocation3], %s1517_s25 }
  0x18   : > { %s1432_s8 = smov 128   ;;  %s1433_s15 = smov 8  }
  0x19   : > { %1221 = dma.hbm_to_vmem [thread:$0]  (!%p1526_p0), %s148_s5, 2048, %s150_s4, %s136_s7, %s1432_s8, %s1432_s8, %s1433_s15  }
  0x1a   : > { %p181_p2 = scmp.lt.s32.totalorder %s1430_s14, 3  ;;  %s170_s20 = scalar_lea.hbm %s2747_s1, %s1210_s27 }
  0x1b   : > { %s171_s28 = sshll.u32 %s170_s20, 4  ;;  %s163_s19 = scalar_lea.vmem [#allocation5], %s1199_s26  ;;  %s172_s28 = int_to_ptr.hbm [resolvable:$true] %s171_s28 }
  0x1c   : > { %p182_p3 = pnand %p1205_p1, %p181_p2  ;;  %s173_s29 = sshll.u32 %s163_s19, 4  ;;  %s174_s29 = int_to_ptr.vmem [resolvable:$true] %s173_s29 }
  0x1d   : > { %s160_s30 = scalar_lea.sflag [#allocation6], %s1517_s25 }
  0x1e   : > { %1224 = dma.hbm_to_vmem [thread:$0]  (!%p1526_p0), %s172_s28, 2048, %s174_s29, %s160_s30, %s1432_s8, %s1432_s8, %s1433_s15  }
  0x1f   : > { %185 = sbr.rel (%p182_p3) target bundleno = 388 (0x184), region = 28 }
  0x24   : > { %s1542_s3 = sand.u32 1, %s1414_s10  }
  0x25   : > { %s1206_s4 = sshll.u32 %s1542_s3, 7  ;;  %s188_s5 = scalar_lea.sflag [#allocation3], %s1542_s3 }
  0x26   : > { %s1546_s7 = scalar_lea.vmem [#allocation2], %s1206_s4 }
  0x27   : > { %1397 = dma.done.wait (%p1499_p8), %s188_s5, 2048  }
  0x28   : > { %1399 = vsyncadd (%p1499_p8), %s188_s5, 4294965248  ;;  %s198_s25 = scalar_lea.sflag [#allocation6], %s1542_s3  ;;  %s1553_s26 = scalar_lea.vmem [#allocation5], %s1206_s4 }
  0x29   : > { %1401 = dma.done.wait (%p1499_p8), %s198_s25, 2048  }
  0x2a   : > { %1403 = vsyncadd (%p1499_p8), %s198_s25, 4294965248  ;;  %v1560_v0 = vld [vmem:[%s1553_s26] sm:$0xff]  ;;  %v1563_v1 = vld [vmem:[%s1553_s26 + $0x10] sm:$0xff]  ;;  %s1434_s27 = smov 127   ;;  %v261_v16 = vlaneseq  ;;  %v2749_v28 = vmov 0.0   ;;  %s1436_s21 = smov 1  }
  0x2b   : > { %397 = vrot.lane.b32.xlu0 %v1560_v0, %s1434_s27  ;;  %401 = vrot.lane.b32.xlu1 %v1563_v1, %s1434_s27  ;;  %v1570_v2 = vld [vmem:[%s1553_s26 + $0x20] sm:$0xff]  ;;  %v1575_v3 = vld [vmem:[%s1553_s26 + $0x8] sm:$0xff]  ;;  %s1087_s15 = scalar_lea.hbm %s2748_s2, %s1422_s12  ;;  %s226_s16 = scalar_lea.vmem [#allocation7], %s1542_s3 }
  0x2c   : > { %405 = vrot.lane.b32.xlu2 %v1570_v2, %s1434_s27  ;;  %v1578_v4 = vld [vmem:[%s1553_s26 + $0x18] sm:$0xff]  ;;  %v1581_v5 = vld [vmem:[%s1553_s26 + $0x28] sm:$0xff]  ;;  %v1593_v7 = vld [vmem:[%s1553_s26 + $0x30] sm:$0xff]  ;;  %v279_v17 = vand.u32 127, %v261_v16  ;;  %s1089_s18 = sshll.u32 %s226_s16, 4  ;;  %s1091_s20 = sshll.u32 %s1087_s15, 4  ;;  %s1090_s18 = int_to_ptr.vmem [resolvable:$true] %s1089_s18  ;;  %s1092_s20 = int_to_ptr.hbm [resolvable:$true] %s1091_s20 }
  0x2d   : > { %v1590_v6 = vld [vmem:[%s1553_s26 + $0x38] sm:$0xff]  ;;  %v1596_v8 = vld [vmem:[%s1553_s26 + $0x40] sm:$0xff]  ;;  %v1605_v9 = vld [vmem:[%s1553_s26 + $0x50] sm:$0xff]  ;;  %s1078_s28 = scalar_lea.sflag [#allocation4], %s1542_s3  ;;  %s1358_s19 = sshra.s32 %s1092_s20, 4  ;;  %s1359_s19 = int_to_ptr.hbm [resolvable:$true] %s1358_s19 }
  0x2e   : > { %v1608_v10 = vld [vmem:[%s1553_s26 + $0x48] sm:$0xff]  ;;  %v1611_v11 = vld [vmem:[%s1553_s26 + $0x58] sm:$0xff]  ;;  %v1623_v13 = vld [vmem:[%s1553_s26 + $0x60] sm:$0xff]  ;;  %v315_v18 = vand.u32 63, %v279_v17  ;;  %s1360_s29 = scalar_lea.hbm %s1359_s19, 1  ;;  %s1364_s12 = scalar_lea.hbm %s2748_s2, 2 }
  0x2f   : > { %v1620_v12 = vld [vmem:[%s1553_s26 + $0x68] sm:$0xff]  ;;  %v1626_v14 = vld [vmem:[%s1553_s26 + $0x70] sm:$0xff]  ;;  %v1635_v15 = vld [vmem:[%s1553_s26 + $0x78] sm:$0xff]  ;;  %p1361_p4 = scmp.ne.s32.totalorder %s1359_s19, %s1360_s29  ;;  %p1365_p7 = scmp.lt.s32.totalorder %s1359_s19, %s2748_s2 }
  0x30   : > { %2793 = vst [vmem:[#allocation11_spill] sm:$0xff] %v1626_v14  ;;  %vm1642_vm0 = vcmp.lt.s32.totalorder %v315_v18, 63  ;;  %v2751_v26 = vrot.slane %v1635_v15, 1  ;;  %p1366_p8 = scmp.lt.s32.totalorder %s1364_s12, %s1360_s29 }
  0x31   : > { %2794 = vst [vmem:[#allocation12_spill] sm:$0xff] %v1635_v15  ;;  %p1362_p5 = pnand %p1361_p4, %p1503_p9 }
  0x32   : > { %p1367_p10 = por %p1366_p8, %p1365_p7 }
  0x33   : > { %399 = vrot.lane.b32.xlu0 %v1575_v3, %s1434_s27  ;;  %403 = vrot.lane.b32.xlu1 %v1578_v4, %s1434_s27  ;;  %p1363_p6 = pneg %p1362_p5 }
  0x34   : > { %407 = vrot.lane.b32.xlu2 %v1581_v5, %s1434_s27 }
  0x35   : > { %p1368_p13 = pnand %p1367_p10, %p1363_p6 }
  0x3b   : > { %411 = vrot.lane.b32.xlu1 %v1590_v6, %s1434_s27  ;;  %409 = vrot.lane.b32.xlu0 %v1593_v7, %s1434_s27 }
  0x3c   : > { %413 = vrot.lane.b32.xlu2 %v1596_v8, %s1434_s27 }
  0x43   : > { %417 = vrot.lane.b32.xlu1 %v1605_v9, %s1434_s27  ;;  %415 = vrot.lane.b32.xlu0 %v1608_v10, %s1434_s27 }
  0x44   : > { %419 = vrot.lane.b32.xlu2 %v1611_v11, %s1434_s27 }
  0x4b   : > { %423 = vrot.lane.b32.xlu1 %v1620_v12, %s1434_s27  ;;  %421 = vrot.lane.b32.xlu0 %v1623_v13, %s1434_s27 }
  0x4c   : > { %425 = vrot.lane.b32.xlu2 %v1626_v14, %s1434_s27 }
  0x53   : > { %427 = vrot.lane.b32.xlu0 %v1635_v15, %s1434_s27 }
  0x86   : > { %v406_v23 = vpop.permute.xlu2 %405 }
  0x87   : > { %v466_v30 = vadd.f32 %v406_v23, %v1570_v2 }
  0x89   : > { %v482_v37 = vmin.f32 %v466_v30, 10.0 }
  0x8b   : > { %vm530_vm10 = vcmp.lt.f32.partialorder %v482_v37, 3.0 }
  0x8c   : > { %vm546_vm14 = vmand %vm1642_vm0, %vm530_vm10 }
  0x8d   : > { %v1696_v46 = vsel %vm546_vm14, 0.00012400794, %v2749_v28 }
  0x8e   : > { %v408_v39 = vpop.permute.xlu2 %407 }
  0x8f   : > { %v467_v42 = vadd.f32 %v408_v39, %v1581_v5 }
  0x91   : > { %v483_v44 = vmin.f32 %v467_v42, 10.0 }
  0x93   : > { %vm531_vm10 = vcmp.lt.f32.partialorder %v483_v44, 3.0 }
  0x96   : > { %v414_v54 = vpop.permute.xlu2 %413 }
  0x97   : > { %v470_v56 = vadd.f32 %v414_v54, %v1596_v8 }
  0x99   : > { %v486_v59 = vmin.f32 %v470_v56, 10.0 }
  0x9b   : > { %vm630_vm14 = vcmp.ge.f32.partialorder %v486_v59, 10.0 }
  0x9d   : > { %v398_v19 = vpop.permute.xlu0 %397  ;;  %v402_v20 = vpop.permute.xlu1 %401 }
  0x9e   : > { %v462_v21 = vadd.f32 %v398_v19, %v1560_v0  ;;  %v464_v22 = vadd.f32 %v402_v20, %v1563_v1 }
  0xa0   : > { %v478_v24 = vmin.f32 %v462_v21, 10.0  ;;  %v480_v25 = vmin.f32 %v464_v22, 10.0  ;;  %v420_v22 = vpop.permute.xlu2 %419 }
  0xa2   : > { %vm526_vm1 = vcmp.lt.f32.partialorder %v478_v24, 3.0  ;;  %vm622_vm2 = vcmp.ge.f32.partialorder %v478_v24, 10.0  ;;  %vm1648_vm4 = vcmp.ge.f32.partialorder %v480_v25, 10.0  ;;  %vm528_vm13 = vcmp.lt.f32.partialorder %v480_v25, 3.0 }
  0xa3   : > { %vm638_vm3 = vmand %vm1642_vm0, %vm622_vm2  ;;  %vm627_vm2 = vcmp.ge.f32.partialorder %v483_v44, 10.0  ;;  %v473_v24 = vadd.f32 %v420_v22, %v1611_v11  ;;  %v1877_v22 = vshrl.u32 %v261_v16, 7 }
  0xa4   : > { %v1653_v29 = vsel %vm638_vm3, 0.00012400794, %v2749_v28  ;;  %vm542_vm5 = vmand %vm1642_vm0, %vm526_vm1  ;;  %vm626_vm3 = vcmp.ge.f32.partialorder %v482_v37, 10.0 }
  0xa5   : > { %831 = vrot.lane.b32.xlu0 %v1653_v29, %s1436_s21  ;;  %v1661_v31 = vsel %vm542_vm5, 0.00012400794, %v2749_v28  ;;  %v400_v32 = vpop.permute.xlu0 %399  ;;  %v404_v33 = vpop.permute.xlu1 %403  ;;  %vm640_vm6 = vmand %vm1642_vm0, %vm1648_vm4  ;;  %v489_v30 = vmin.f32 %v473_v24, 10.0 }
  0xa6   : > { %718 = vrot.lane.b32.xlu1 %v1661_v31, %s1436_s21  ;;  %v463_v34 = vadd.f32 %v400_v32, %v1575_v3  ;;  %v465_v35 = vadd.f32 %v404_v33, %v1578_v4  ;;  %v1672_v40 = vsel %vm640_vm6, 0.00012400794, %v2749_v28  ;;  %vm544_vm1 = vmand %vm1642_vm0, %vm528_vm13 }
  0xa7   : > { %v1707_v50 = vsel %vm544_vm1, 0.00012400794, %v2749_v28  ;;  %vm643_vm5 = vmand %vm1642_vm0, %vm627_vm2 }
  0xa8   : > { %v479_v36 = vmin.f32 %v463_v34, 10.0  ;;  %v481_v38 = vmin.f32 %v465_v35, 10.0  ;;  %vm642_vm6 = vmand %vm1642_vm0, %vm626_vm3  ;;  %v1719_v55 = vsel %vm643_vm5, 0.00012400794, %v2749_v28  ;;  %v426_v44 = vpop.permute.xlu2 %425 }
  0xa9   : > { %2799 = vst [vmem:[#allocation13_spill] sm:$0xff] %v1719_v55  ;;  %v1727_v57 = vsel %vm642_vm6, 0.00012400794, %v2749_v28  ;;  %vm547_vm13 = vmand %vm1642_vm0, %vm531_vm10 }
  0xaa   : > { %vm527_vm7 = vcmp.lt.f32.partialorder %v479_v36, 3.0  ;;  %vm623_vm8 = vcmp.ge.f32.partialorder %v479_v36, 10.0  ;;  %vm529_vm12 = vcmp.lt.f32.partialorder %v481_v38, 3.0  ;;  %vm625_vm4 = vcmp.ge.f32.partialorder %v481_v38, 10.0  ;;  %2800 = vst [vmem:[#allocation14_spill] sm:$0xff] %v1727_v57  ;;  %vm646_vm2 = vmand %vm1642_vm0, %vm630_vm14 }
  0xab   : > { %vm639_vm9 = vmand %vm1642_vm0, %vm623_vm8  ;;  %v1752_v18 = vsel %vm547_vm13, 0.00012400794, %v2749_v28  ;;  %v1764_v23 = vsel %vm646_vm2, 0.00012400794, %v2749_v28 }
  0xac   : > { %v1677_v41 = vsel %vm639_vm9, 0.00012400794, %v2749_v28  ;;  %vm543_vm11 = vmand %vm1642_vm0, %vm527_vm7  ;;  %2803 = vst [vmem:[#allocation17_spill] sm:$0xff] %v1764_v23 }
  0xad   : > { %835 = vrot.lane.b32.xlu0 %v1672_v40, %s1436_s21  ;;  %v1685_v43 = vsel %vm543_vm11, 0.00012400794, %v2749_v28  ;;  %vm545_vm15 = vmand %vm1642_vm0, %vm529_vm12  ;;  %v412_v45 = vpop.permute.xlu1 %411  ;;  %v410_v47 = vpop.permute.xlu0 %409 }
  0xae   : > { %833 = vrot.lane.b32.xlu1 %v1677_v41, %s1436_s21  ;;  %720 = vrot.lane.b32.xlu2 %v1685_v43, %s1436_s21  ;;  %v1701_v48 = vsel %vm545_vm15, 0.00012400794, %v2749_v28  ;;  %v469_v49 = vadd.f32 %v412_v45, %v1590_v6  ;;  %v468_v51 = vadd.f32 %v410_v47, %v1593_v7  ;;  %vm641_vm7 = vmand %vm1642_vm0, %vm625_vm4  ;;  %v476_v47 = vadd.f32 %v426_v44, %v1626_v14 }
  0xaf   : > { %v1730_v58 = vsel %vm641_vm7, 0.00012400794, %v2749_v28  ;;  %vm534_vm7 = vcmp.lt.f32.partialorder %v486_v59, 3.0 }
  0xb0   : > { %v485_v52 = vmin.f32 %v469_v49, 10.0  ;;  %v484_v53 = vmin.f32 %v468_v51, 10.0  ;;  %vm550_vm10 = vmand %vm1642_vm0, %vm534_vm7 }
  0xb1   : > { %v1797_v37 = vsel %vm550_vm10, 0.00012400794, %v2749_v28 }
  0xb2   : > { %vm533_vm8 = vcmp.lt.f32.partialorder %v485_v52, 3.0  ;;  %vm532_vm9 = vcmp.lt.f32.partialorder %v484_v53, 3.0  ;;  %vm628_vm15 = vcmp.ge.f32.partialorder %v484_v53, 10.0  ;;  %vm629_vm1 = vcmp.ge.f32.partialorder %v485_v52, 10.0  ;;  %2808 = vst [vmem:[#allocation22_spill] sm:$0xff] %v1797_v37 }
  0xb3   : > { %vm549_vm11 = vmand %vm1642_vm0, %vm533_vm8  ;;  %v492_v52 = vmin.f32 %v476_v47, 10.0 }
  0xb4   : > { %vm548_vm12 = vmand %vm1642_vm0, %vm532_vm9  ;;  %v1741_v61 = vsel %vm549_vm11, 0.00012400794, %v2749_v28  ;;  %vm633_vm11 = vcmp.ge.f32.partialorder %v489_v30, 10.0 }
  0xb5   : > { %726 = vrot.lane.b32.xlu0 %v1696_v46, %s1436_s21  ;;  %v418_v60 = vpop.permute.xlu1 %417  ;;  %2801 = vst [vmem:[#allocation15_spill] sm:$0xff] %v1741_v61  ;;  %v416_v62 = vpop.permute.xlu0 %415  ;;  %v1746_v63 = vsel %vm548_vm12, 0.00012400794, %v2749_v28  ;;  %vm644_vm3 = vmand %vm1642_vm0, %vm628_vm15 }
  0xb6   : > { %724 = vrot.lane.b32.xlu1 %v1701_v48, %s1436_s21  ;;  %722 = vrot.lane.b32.xlu2 %v1707_v50, %s1436_s21  ;;  %2802 = vst [vmem:[#allocation16_spill] sm:$0xff] %v1746_v63  ;;  %v472_v17 = vadd.f32 %v418_v60, %v1605_v9  ;;  %v471_v19 = vadd.f32 %v416_v62, %v1608_v10  ;;  %vm645_vm4 = vmand %vm1642_vm0, %vm629_vm1  ;;  %v1772_v25 = vsel %vm644_vm3, 0.00012400794, %v2749_v28 }
  0xb7   : > { %2804 = vst [vmem:[#allocation18_spill] sm:$0xff] %v1772_v25  ;;  %v1775_v27 = vsel %vm645_vm4, 0.00012400794, %v2749_v28  ;;  %vm649_vm14 = vmand %vm1642_vm0, %vm633_vm11  ;;  %vm537_vm4 = vcmp.lt.f32.partialorder %v489_v30, 3.0  ;;  %v431_v30 = vrot.slane %v1563_v1, 1 }
  0xb8   : > { %v488_v20 = vmin.f32 %v472_v17, 10.0  ;;  %v487_v21 = vmin.f32 %v471_v19, 10.0  ;;  %2805 = vst [vmem:[#allocation19_spill] sm:$0xff] %v1775_v27  ;;  %v1809_v45 = vsel %vm649_vm14, 0.00012400794, %v2749_v28  ;;  %vm553_vm7 = vmand %vm1642_vm0, %vm537_vm4  ;;  %vm445_vm4 = vcmp.lt.s32.totalorder %v1877_v22, 7 }
  0xb9   : > { %2809 = vst [vmem:[#allocation23_spill] sm:$0xff] %v1809_v45  ;;  %v1841_v59 = vsel %vm553_vm7, 0.00012400794, %v2749_v28 }
  0xba   : > { %vm536_vm5 = vcmp.lt.f32.partialorder %v488_v20, 3.0  ;;  %vm535_vm6 = vcmp.lt.f32.partialorder %v487_v21, 3.0  ;;  %vm631_vm12 = vcmp.ge.f32.partialorder %v487_v21, 10.0  ;;  %vm632_vm13 = vcmp.ge.f32.partialorder %v488_v20, 10.0  ;;  %2814 = vst [vmem:[#allocation28_spill] sm:$0xff] %v1841_v59 }
  0xbb   : > { %vm552_vm8 = vmand %vm1642_vm0, %vm536_vm5 }
  0xbc   : > { %vm551_vm9 = vmand %vm1642_vm0, %vm535_vm6  ;;  %v1786_v33 = vsel %vm552_vm8, 0.00012400794, %v2749_v28  ;;  %vm636_vm8 = vcmp.ge.f32.partialorder %v492_v52, 10.0 }
  0xbd   : > { %841 = vrot.lane.b32.xlu0 %v1719_v55, %s1436_s21  ;;  %v424_v32 = vpop.permute.xlu1 %423  ;;  %2806 = vst [vmem:[#allocation20_spill] sm:$0xff] %v1786_v33  ;;  %v422_v34 = vpop.permute.xlu0 %421  ;;  %v1791_v35 = vsel %vm551_vm9, 0.00012400794, %v2749_v28  ;;  %vm647_vm15 = vmand %vm1642_vm0, %vm631_vm12 }
  0xbe   : > { %839 = vrot.lane.b32.xlu1 %v1727_v57, %s1436_s21  ;;  %837 = vrot.lane.b32.xlu2 %v1730_v58, %s1436_s21  ;;  %2807 = vst [vmem:[#allocation21_spill] sm:$0xff] %v1791_v35  ;;  %v475_v36 = vadd.f32 %v424_v32, %v1620_v12  ;;  %v474_v38 = vadd.f32 %v422_v34, %v1623_v13  ;;  %vm648_vm1 = vmand %vm1642_vm0, %vm632_vm13  ;;  %v1817_v49 = vsel %vm647_vm15, 0.00012400794, %v2749_v28  ;;  %vm540_vm15 = vcmp.lt.f32.partialorder %v492_v52, 3.0 }
  0xbf   : > { %2810 = vst [vmem:[#allocation24_spill] sm:$0xff] %v1817_v49  ;;  %v1820_v51 = vsel %vm648_vm1, 0.00012400794, %v2749_v28  ;;  %vm652_vm11 = vmand %vm1642_vm0, %vm636_vm8  ;;  %v430_v32 = vrot.slane %v1575_v3, 1  ;;  %v429_v34 = vrot.slane %v1560_v0, 1 }
  0xc0   : > { %v491_v39 = vmin.f32 %v475_v36, 10.0  ;;  %v490_v42 = vmin.f32 %v474_v38, 10.0  ;;  %2811 = vst [vmem:[#allocation25_spill] sm:$0xff] %v1820_v51  ;;  %v1853_v17 = vsel %vm652_vm11, 0.00012400794, %v2749_v28  ;;  %v432_v36 = vrot.slane %v1578_v4, 1 }
  0xc1   : > { %2815 = vst [vmem:[#allocation29_spill] sm:$0xff] %v1853_v17  ;;  %v459_v16 = vsel %vm445_vm4, %v430_v32, %v431_v30 }
  0xc2   : > { %vm539_vm2 = vcmp.lt.f32.partialorder %v491_v39, 3.0  ;;  %vm538_vm3 = vcmp.lt.f32.partialorder %v490_v42, 3.0  ;;  %vm634_vm9 = vcmp.ge.f32.partialorder %v490_v42, 10.0  ;;  %vm635_vm10 = vcmp.ge.f32.partialorder %v491_v39, 10.0 }
  0xc3   : > { %vm555_vm5 = vmand %vm1642_vm0, %vm539_vm2  ;;  %v460_v39 = vsel %vm445_vm4, %v429_v34, %v430_v32  ;;  %v433_v42 = vrot.slane %v1570_v2, 1  ;;  %v495_v44 = vadd.f32 %v459_v16, %v1575_v3  ;;  %v458_v47 = vsel %vm445_vm4, %v431_v30, %v432_v36 }
  0xc4   : > { %vm554_vm6 = vmand %vm1642_vm0, %vm538_vm3  ;;  %v1831_v53 = vsel %vm555_vm5, 0.00012400794, %v2749_v28  ;;  %v494_v52 = vadd.f32 %v460_v39, %v1560_v0  ;;  %v496_v32 = vadd.f32 %v458_v47, %v1563_v1  ;;  %v435_v3 = vrot.slane %v1593_v7, 1 }
  0xc5   : > { %732 = vrot.lane.b32.xlu0 %v1741_v61, %s1436_s21  ;;  %2812 = vst [vmem:[#allocation26_spill] sm:$0xff] %v1831_v53  ;;  %v428_v54 = vpop.permute.xlu0 %427  ;;  %v1836_v56 = vsel %vm554_vm6, 0.00012400794, %v2749_v28  ;;  %vm650_vm12 = vmand %vm1642_vm0, %vm634_vm9  ;;  %v434_v30 = vrot.slane %v1581_v5, 1 }
  0xc6   : > { %728 = vrot.lane.b32.xlu2 %v1752_v18, %s1436_s21  ;;  %730 = vrot.lane.b32.xlu1 %v1746_v63, %s1436_s21  ;;  %2813 = vst [vmem:[#allocation27_spill] sm:$0xff] %v1836_v56  ;;  %v477_v60 = vadd.f32 %v428_v54, %v1635_v15  ;;  %vm651_vm13 = vmand %vm1642_vm0, %vm635_vm10  ;;  %v1860_v19 = vsel %vm650_vm12, 0.00012400794, %v2749_v28  ;;  %v511_v54 = vmin.f32 %v495_v44, 10.0  ;;  %v512_v39 = vmin.f32 %v496_v32, 10.0 }
  0xc7   : > { %2816 = vst [vmem:[#allocation30_spill] sm:$0xff] %v1860_v19  ;;  %v1863_v20 = vsel %vm651_vm13, 0.00012400794, %v2749_v28  ;;  %vm556_vm2 = vmand %vm1642_vm0, %vm540_vm15  ;;  %vm798_vm12 = vcmp.lt.s32.totalorder %v1877_v22, 1 }
  0xc8   : > { %v493_v62 = vmin.f32 %v477_v60, 10.0  ;;  %2817 = vst [vmem:[#allocation31_spill] sm:$0xff] %v1863_v20  ;;  %v1880_v24 = vsel %vm556_vm2, 0.00012400794, %v2749_v28  ;;  %v457_v60 = vsel %vm445_vm4, %v432_v36, %v433_v42  ;;  %v277_v36 = vadd.s32 120, %v1877_v22 }
  0xc9   : > { %2819 = vst [vmem:[#allocation33_spill] sm:$0xff] %v1880_v24  ;;  %v1917_v16 = vadd.f32 %v457_v60, %v1578_v4  ;;  %v455_v4 = vsel %vm445_vm4, %v434_v30, %v435_v3  ;;  %vm576_vm7 = vcmp.lt.f32.partialorder %v512_v39, 3.0  ;;  %vm672_vm9 = vcmp.ge.f32.partialorder %v512_v39, 10.0 }
  0xca   : > { %vm541_vm14 = vcmp.lt.f32.partialorder %v493_v62, 3.0  ;;  %vm637_vm3 = vcmp.ge.f32.partialorder %v493_v62, 10.0  ;;  %v461_v62 = vsel %vm445_vm4, %v2751_v26, %v429_v34  ;;  %v2821_v34 = vmov 0.0  }
  0xcb   : > { %vm557_vm1 = vmand %vm1642_vm0, %vm541_vm14  ;;  %v509_v0 = vadd.f32 %v461_v62, %v1635_v15  ;;  %v436_v62 = vrot.slane %v1590_v6, 1  ;;  %v456_v26 = vsel %vm445_vm4, %v433_v42, %v434_v30  ;;  %vm671_vm15 = vcmp.ge.f32.partialorder %v511_v54, 10.0 }
  0xcc   : > { %v1874_v21 = vsel %vm557_vm1, 0.00012400794, %v2749_v28  ;;  %vm653_vm5 = vmand %vm1642_vm0, %vm637_vm3  ;;  %vm575_vm0 = vcmp.lt.f32.partialorder %v511_v54, 3.0 }
  0xcd   : > { %847 = vrot.lane.b32.xlu0 %v1764_v23, %s1436_s21  ;;  %2818 = vst [vmem:[#allocation32_spill] sm:$0xff] %v1874_v21  ;;  %v1896_v38 = vsel %vm653_vm5, 0.00012400794, %v2749_v28  ;;  %v510_v28 = vmin.f32 %v494_v52, 10.0  ;;  %v1925_v1 = vsel %vm575_vm0, 0.00012400794, %v2821_v34  ;;  %v454_v42 = vsel %vm445_vm4, %v435_v3, %v436_v62 }
  0xce   : > { %843 = vrot.lane.b32.xlu2 %v1772_v25, %s1436_s21  ;;  %845 = vrot.lane.b32.xlu1 %v1775_v27, %s1436_s21  ;;  %2820 = vst [vmem:[#allocation34_spill] sm:$0xff] %v1896_v38  ;;  %v332_v52 = vand.u32 63, %v277_v36  ;;  %v525_v60 = vmin.f32 %v509_v0, 10.0  ;;  %v783_v47 = vrot.slane %v1925_v1, 7  ;;  %v2822_v0 = vmin.f32 %v1917_v16, 10.0 }
  0xcf   : > { %vm574_vm6 = vcmp.lt.f32.partialorder %v510_v28, 3.0  ;;  %v1945_v36 = vadd.f32 %v455_v4, %v1581_v5  ;;  %vm1974_vm14 = vcmp.ge.f32.partialorder %v510_v28, 10.0  ;;  %v2002_v54 = vadd.f32 %v454_v42, %v1593_v7 }
  0xd0   : > { %v1933_v32 = vsel %vm574_vm6, 0.00012400794, %v2821_v34  ;;  %vm673_vm8 = vcmp.ge.f32.partialorder %v2822_v0, 10.0  ;;  %vm1953_vm10 = vcmp.lt.s32.totalorder %v332_v52, 63  ;;  %vm1957_vm11 = vcmp.ge.f32.partialorder %v525_v60, 10.0 }
  0xd1   : > { %vm1965_vm13 = vcmp.lt.f32.partialorder %v525_v60, 3.0  ;;  %v1972_v4 = vsel %vm673_vm8, 0.00012400794, %v2821_v34  ;;  %v1979_v0 = vsel %vm672_vm9, 0.00012400794, %v2821_v34  ;;  %vm701_vm1 = vmand %vm1953_vm10, %vm1957_vm11  ;;  %v2840_v63 = vmin.f32 %v2002_v54, 10.0 }
  0xd2   : > { %vm605_vm2 = vmand %vm1953_vm10, %vm1965_vm13  ;;  %v2017_v3 = vsel %vm671_vm15, 0.00012400794, %v2821_v34  ;;  %v2021_v42 = vsel %vm701_vm1, 0.00012400794, %v2821_v34 }
  0xd3   : > { %2832 = vst [vmem:[#allocation35_spill] sm:$0xff] %v2021_v42  ;;  %vm676_vm6 = vcmp.ge.f32.partialorder %v2840_v63, 10.0  ;;  %v2842_v25 = vrot.slane %v2021_v42, 7  ;;  %v2846_v42 = vrot.slane %v1605_v9, 1 }
  0xd5   : > { %738 = vrot.lane.b32.xlu0 %v1786_v33, %s1436_s21 }
  0xd6   : > { %734 = vrot.lane.b32.xlu2 %v1797_v37, %s1436_s21  ;;  %736 = vrot.lane.b32.xlu1 %v1791_v35, %s1436_s21  ;;  %v2836_v35 = vrot.slane %v1979_v0, 7  ;;  %v2837_v37 = vmin.f32 %v1917_v16, 10.0 }
  0xd8   : > { %vm577_vm0 = vcmp.lt.f32.partialorder %v2837_v37, 3.0 }
  0xdd   : > { %853 = vrot.lane.b32.xlu0 %v1809_v45, %s1436_s21  ;;  %v2834_v45 = vrot.slane %v1596_v8, 1 }
  0xde   : > { %849 = vrot.lane.b32.xlu2 %v1817_v49, %s1436_s21  ;;  %851 = vrot.lane.b32.xlu1 %v1820_v51, %s1436_s21 }
  0xdf   : > { %v453_v33 = vsel %vm445_vm4, %v436_v62, %v2834_v45 }
  0xe0   : > { %v2074_v57 = vadd.f32 %v453_v33, %v1590_v6 }
  0xe5   : > { %744 = vrot.lane.b32.xlu0 %v1831_v53, %s1436_s21  ;;  %v515_v53 = vmin.f32 %v1945_v36, 10.0  ;;  %v269_v36 = vadd.s32 56, %v1877_v22 }
  0xe6   : > { %740 = vrot.lane.b32.xlu2 %v1841_v59, %s1436_s21  ;;  %742 = vrot.lane.b32.xlu1 %v1836_v56, %s1436_s21  ;;  %v229_v56 = vld [vmem:[%s1546_s7] sm:$0xff]  ;;  %v230_v59 = vld [vmem:[%s1546_s7 + $0x8] sm:$0xff] }
  0xe7   : > { %v2029_v52 = vmul.f32 %v230_v59, %v230_v59  ;;  %vm579_vm3 = vcmp.lt.f32.partialorder %v515_v53, 3.0  ;;  %v944_v55 = vsub.f32 20.0, %v230_v59  ;;  %v2089_v6 = vmul.f32 %v229_v56, %v229_v56 }
  0xe8   : > { %v2061_v45 = vsel %vm579_vm3, 0.00012400794, %v2821_v34  ;;  %v2093_v59 = vsel %vm577_vm0, 0.00012400794, %v2821_v34 }
  0xe9   : > { %2843 = vst [vmem:[#allocation38_spill] sm:$0xff] %v2089_v6 }
  0xea   : > { %2844 = vst [vmem:[#allocation39_spill] sm:$0xff] %v2093_v59 }
  0xed   : > { %859 = vrot.lane.b32.xlu0 %v1853_v17, %s1436_s21  ;;  %v231_v17 = vld [vmem:[%s1546_s7 + $0x10] sm:$0xff] }
  0xee   : > { %855 = vrot.lane.b32.xlu2 %v1860_v19, %s1436_s21  ;;  %857 = vrot.lane.b32.xlu1 %v1863_v20, %s1436_s21  ;;  %v2013_v19 = vsel %vm1974_vm14, 0.00012400794, %v2821_v34  ;;  %v943_v20 = vsub.f32 20.0, %v229_v56  ;;  %v2034_v28 = vmul.f32 %v231_v17, %v231_v17  ;;  %v324_v56 = vand.u32 63, %v269_v36 }
  0xf0   : > { %v991_v62 = vmul.f32 %v943_v20, %v943_v20  ;;  %v945_v20 = vsub.f32 20.0, %v231_v17  ;;  %v785_v17 = vrot.slane %v2093_v59, 7  ;;  %vm2145_vm9 = vcmp.lt.s32.totalorder %v324_v56, 63 }
  0xf2   : > { %v993_v33 = vmul.f32 %v945_v20, %v945_v20 }
  0xf4   : > { %v2165_v56 = vmul.f32 0.1, %v993_v33 }
  0xf6   : > { %746 = vrot.lane.b32.xlu2 %v1880_v24, %s1436_s21  ;;  %748 = vrot.lane.b32.xlu1 %v1874_v21, %s1436_s21  ;;  %v1940_v24 = vld [vmem:[%s1546_s7 + $0x18] sm:$0xff]  ;;  %v1950_v21 = vsel %vm576_vm7, 0.00012400794, %v2821_v34  ;;  %vm675_vm7 = vcmp.ge.f32.partialorder %v515_v53, 10.0  ;;  %v2101_v53 = vmul.f32 0.1, %v991_v62 }
  0xf7   : > { %v946_v5 = vsub.f32 20.0, %v1940_v24  ;;  %v2764_v60 = vrot.slane %v1950_v21, 7 }
  0xf9   : > { %v2027_v30 = vsel %vm798_vm12, %v783_v47, %v2764_v60  ;;  %v2835_v60 = vrot.slane %v1972_v4, 7 }
  0xfb   : > { %v2051_v23 = vsel %vm798_vm12, %v2836_v35, %v2835_v60  ;;  %v2838_v35 = vrot.slane %v1608_v10, 1  ;;  %v2839_v60 = vrot.slane %v1596_v8, 1 }
  0xfe   : > { %861 = vrot.lane.b32.xlu2 %v1896_v38, %s1436_s21  ;;  %v1982_v38 = vadd.f32 %v456_v26, %v1570_v2  ;;  %v2831_v2 = vrot.slane %v1933_v32, 7 }
 0x100   : > { %v1999_v26 = vsel %vm798_vm12, %v2831_v2, %v783_v47  ;;  %v994_v2 = vmul.f32 %v946_v5, %v946_v5  ;;  %v514_v7 = vmin.f32 %v1982_v38, 10.0  ;;  %v2032_v5 = vsel %vm605_vm2, 0.00012400794, %v2821_v34 }
 0x101   : > { %2833 = vst [vmem:[#allocation36_spill] sm:$0xff] %v2032_v5  ;;  %v895_v38 = vrot.slane %v2013_v19, 7  ;;  %v896_v47 = vrot.slane %v2017_v3, 7  ;;  %v2849_v6 = vrot.slane %v2032_v5, 7 }
 0x102   : > { %v2053_v49 = vmul.f32 0.1, %v994_v2  ;;  %vm578_vm5 = vcmp.lt.f32.partialorder %v514_v7, 3.0  ;;  %v452_v2 = vsel %vm445_vm4, %v2839_v60, %v2838_v35  ;;  %v992_v60 = vmul.f32 %v944_v55, %v944_v55 }
 0x103   : > { %v2081_v16 = vsel %vm578_vm5, 0.00012400794, %v2821_v34  ;;  %v2087_v35 = vsel %vm798_vm12, %v2842_v25, %v895_v38  ;;  %v2096_v63 = vadd.f32 %v452_v2, %v1596_v8  ;;  %v2107_v25 = vsel %vm675_vm7, 0.00012400794, %v2821_v34 }
 0x104   : > { %2841 = vst [vmem:[#allocation37_spill] sm:$0xff] %v2081_v16  ;;  %v2847_v8 = vrot.slane %v1608_v10, 1  ;;  %v2848_v2 = vrot.slane %v1933_v32, 7  ;;  %v2127_v55 = vsel %vm798_vm12, %v895_v38, %v896_v47  ;;  %vm674_vm8 = vcmp.ge.f32.partialorder %v514_v7, 10.0 }
 0x105   : > { %2845 = vst [vmem:[#allocation40_spill] sm:$0xff] %v2107_v25  ;;  %v2857_v7 = vrot.slane %v1979_v0, 7 }
 0x106   : > { %v451_v62 = vsel %vm445_vm4, %v2847_v8, %v2846_v42  ;;  %v2122_v14 = vsel %vm798_vm12, %v2849_v6, %v2848_v2  ;;  %2850 = vst [vmem:[#allocation41_spill] sm:$0xff] %v2127_v55  ;;  %v786_v42 = vrot.slane %v2081_v16, 7  ;;  %v234_v6 = vld [vmem:[%s1546_s7 + $0x28] sm:$0xff]  ;;  %v2853_v16 = vmin.f32 %v2074_v57, 10.0 }
 0x107   : > { %v2143_v2 = vadd.f32 %v451_v62, %v1608_v10  ;;  %v2163_v10 = vsel %vm798_vm12, %v896_v47, %v2857_v7  ;;  %v2184_v47 = vsel %vm674_vm8, 0.00012400794, %v2821_v34 }
 0x108   : > { %v1922_v44 = vpop.permute.xlu2 %720  ;;  %vm2151_vm10 = vcmp.lt.f32.partialorder %v2853_v16, 3.0  ;;  %v2858_v16 = vrot.slane %v1950_v21, 7  ;;  %2862 = vst [vmem:[#allocation45_spill] sm:$0xff] %v2184_v47  ;;  %v2196_v7 = vsel %vm798_vm12, %v785_v17, %v786_v42 }
 0x109   : > { %v751_v37 = vadd.f32 %v1922_v44, %v1685_v43  ;;  %v2099_v43 = vld [vmem:[%s1546_s7 + $0x30] sm:$0xff]  ;;  %v2104_v44 = vsel %vm676_vm6, 0.00012400794, %v2821_v34  ;;  %vm597_vm13 = vmand %vm2145_vm9, %vm2151_vm10 }
 0x10a   : > { %v949_v38 = vsub.f32 20.0, %v2099_v43  ;;  %v2172_v55 = vsel %vm798_vm12, %v2858_v16, %v785_v17  ;;  %v2864_v16 = vrot.slane %v2104_v44, 7 }
 0x10b   : > { %v767_v36 = vadd.f32 %v751_v37, %v1925_v1  ;;  %v518_v1 = vmin.f32 %v2096_v63, 10.0  ;;  %v900_v37 = vrot.slane %v2107_v25, 7  ;;  %v2157_v25 = vmul.f32 0.1, %v992_v60  ;;  %2859 = vst [vmem:[#allocation43_spill] sm:$0xff] %v2172_v55  ;;  %v233_v60 = vld [vmem:[%s1546_s7 + $0x20] sm:$0xff] }
 0x10c   : > { %v947_v33 = vsub.f32 20.0, %v233_v60  ;;  %v2206_v55 = vmul.f32 %v233_v60, %v233_v60  ;;  %v2870_v60 = vrot.slane %v1611_v11, 1 }
 0x10d   : > { %2856 = vst [vmem:[#allocation42_spill] sm:$0xff] %v2157_v25  ;;  %v816_v62 = vadd.f32 %v1999_v26, %v767_v36  ;;  %v2181_v25 = vmul.f32 %v234_v6, %v234_v6  ;;  %vm582_vm11 = vcmp.lt.f32.partialorder %v518_v1, 3.0  ;;  %v997_v26 = vmul.f32 %v949_v38, %v949_v38 }
 0x10e   : > { %v2192_v36 = vmul.f32 %v1940_v24, %v1940_v24  ;;  %2865 = vst [vmem:[#allocation47_spill] sm:$0xff] %v2206_v55  ;;  %v2866_v24 = vmin.f32 %v2002_v54, 10.0  ;;  %v2220_v38 = vsel %vm597_vm13, 0.00012400794, %v2821_v34  ;;  %vm678_vm1 = vcmp.ge.f32.partialorder %v518_v1, 10.0 }
 0x10f   : > { %2861 = vst [vmem:[#allocation44_spill] sm:$0xff] %v2181_v25  ;;  %v948_v25 = vsub.f32 20.0, %v234_v6  ;;  %v789_v55 = vrot.slane %v2220_v38, 7 }
 0x110   : > { %v1969_v39 = vpop.permute.xlu2 %722  ;;  %2863 = vst [vmem:[#allocation46_spill] sm:$0xff] %v2192_v36  ;;  %vm580_vm14 = vcmp.lt.f32.partialorder %v2866_v24, 3.0  ;;  %v2211_v36 = vmul.f32 %v2029_v52, %v816_v62  ;;  %v995_v52 = vmul.f32 %v947_v33, %v947_v33  ;;  %v2869_v62 = vrot.slane %v1623_v13, 1 }
 0x111   : > { %v752_v63 = vadd.f32 %v1969_v39, %v1707_v50  ;;  %v2860_v50 = vrot.slane %v2061_v45, 7  ;;  %2867 = vst [vmem:[#allocation48_spill] sm:$0xff] %v2220_v38 }
 0x112   : > { %v449_v24 = vsel %vm445_vm4, %v2870_v60, %v2869_v62  ;;  %v2872_v60 = vrot.slane %v1972_v4, 7 }
 0x113   : > { %v2178_v39 = vsel %vm798_vm12, %v786_v42, %v2860_v50  ;;  %v2202_v50 = vsel %vm798_vm12, %v900_v37, %v2864_v16  ;;  %v768_v5 = vadd.f32 %v752_v63, %v1950_v21  ;;  %v899_v42 = vrot.slane %v2184_v47, 7 }
 0x114   : > { %v2217_v16 = vsel %vm582_vm11, 0.00012400794, %v2821_v34  ;;  %v2228_v63 = vmul.f32 0.1, %v997_v26 }
 0x115   : > { %v817_v33 = vadd.f32 %v2027_v30, %v768_v5  ;;  %v2259_v30 = vld [vmem:[%s1546_s7 + $0x40] sm:$0xff]  ;;  %v2270_v5 = vsel %vm678_vm1, 0.00012400794, %v2821_v34 }
 0x116   : > { %2868 = vst [vmem:[#allocation49_spill] sm:$0xff] %v2228_v63  ;;  %v996_v63 = vmul.f32 %v948_v25, %v948_v25  ;;  %v2262_v25 = vadd.f32 %v449_v24, %v1611_v11 }
 0x117   : > { %v2042_v51 = vpop.permute.xlu0 %831  ;;  %v2288_v26 = vmul.f32 %v2034_v28, %v817_v33  ;;  %v2883_v28 = vrot.slane %v1623_v13, 1 }
 0x118   : > { %v2056_v61 = vpop.permute.xlu1 %718  ;;  %v2058_v27 = vpop.permute.xlu2 %837  ;;  %v863_v47 = vadd.f32 %v2042_v51, %v1653_v29  ;;  %v2252_v29 = vsel %vm798_vm12, %v2872_v60, %v899_v42  ;;  %v2256_v51 = vsel %vm798_vm12, %v899_v42, %v900_v37  ;;  %v2273_v37 = vmul.f32 0.1, %v995_v52 }
 0x119   : > { %v866_v21 = vadd.f32 %v2058_v27, %v1730_v58  ;;  %v2239_v58 = vsel %vm580_vm14, 0.00012400794, %v2821_v34  ;;  %v2871_v27 = vmin.f32 %v2143_v2, 10.0  ;;  %v750_v62 = vadd.f32 %v2056_v61, %v1661_v31 }
 0x11a   : > { %v788_v31 = vrot.slane %v2239_v58, 7  ;;  %2873 = vst [vmem:[#allocation50_spill] sm:$0xff] %v2273_v37  ;;  %v2874_v42 = vmin.f32 %v2074_v57, 10.0  ;;  %v2290_v38 = vmul.f32 0.1, %v996_v63  ;;  %v236_v63 = vld [vmem:[%s1546_s7 + $0x38] sm:$0xff] }
 0x11b   : > { %vm679_vm15 = vcmp.ge.f32.partialorder %v2871_v27, 10.0  ;;  %v882_v1 = vadd.f32 %v866_v21, %v1972_v4  ;;  %v879_v27 = vadd.f32 %v863_v47, %v2013_v19  ;;  %v2877_v4 = vrot.slane %v1611_v11, 1  ;;  %v2303_v11 = vld [vmem:[%s1546_s7 + $0x48] sm:$0xff] }
 0x11c   : > { %v2267_v61 = vsel %vm679_vm15, 0.00012400794, %v2821_v34  ;;  %vm2277_vm2 = vcmp.ge.f32.partialorder %v2874_v42, 10.0  ;;  %v2878_v21 = vrot.slane %v1605_v9, 1  ;;  %v2879_v19 = vrot.slane %v2217_v16, 7 }
 0x11d   : > { %v2300_v47 = vmul.f32 %v2259_v30, %v2259_v30  ;;  %v766_v52 = vadd.f32 %v750_v62, %v1933_v32  ;;  %v2881_v32 = vrot.slane %v2061_v45, 7  ;;  %vm693_vm3 = vmand %vm2145_vm9, %vm2277_vm2  ;;  %v927_v33 = vadd.f32 %v2087_v35, %v879_v27 }
 0x11e   : > { %v450_v60 = vsel %vm445_vm4, %v2878_v21, %v2877_v4  ;;  %v2296_v57 = vsel %vm798_vm12, %v789_v55, %v2879_v19  ;;  %v903_v4 = vrot.slane %v2270_v5, 7  ;;  %v930_v21 = vadd.f32 %v2051_v23, %v882_v1 }
 0x11f   : > { %v2129_v20 = vpop.permute.xlu0 %835  ;;  %2880 = vst [vmem:[#allocation51_spill] sm:$0xff] %v2300_v47  ;;  %v2323_v62 = vsel %vm798_vm12, %v2881_v32, %v788_v31  ;;  %v504_v23 = vadd.f32 %v450_v60, %v1605_v9  ;;  %v2882_v1 = vrot.slane %v1620_v12, 1  ;;  %v2344_v9 = vmul.f32 %v2099_v43, %v2099_v43 }
 0x120   : > { %v2133_v8 = vpop.permute.xlu1 %833  ;;  %v2135_v15 = vpop.permute.xlu2 %728  ;;  %v865_v19 = vadd.f32 %v2129_v20, %v1672_v40  ;;  %v952_v20 = vsub.f32 20.0, %v2303_v11  ;;  %v2353_v24 = vsel %vm693_vm3, 0.00012400794, %v2821_v34  ;;  %v950_v60 = vsub.f32 20.0, %v236_v63 }
 0x121   : > { %v864_v40 = vadd.f32 %v2133_v8, %v1677_v41  ;;  %v448_v32 = vsel %vm445_vm4, %v2883_v28, %v2882_v1  ;;  %v755_v59 = vadd.f32 %v2135_v15, %v1752_v18  ;;  %v2348_v41 = vsel %vm798_vm12, %v788_v31, %v789_v55 }
 0x122   : > { %v2350_v8 = vmul.f32 %v236_v63, %v236_v63  ;;  %v2884_v28 = vmin.f32 %v2262_v25, 10.0  ;;  %v2885_v35 = vrot.slane %v2267_v61, 7  ;;  %v881_v18 = vadd.f32 %v865_v19, %v1979_v0 }
 0x123   : > { %v2365_v43 = vmul.f32 %v2053_v49, %v930_v21  ;;  %v2368_v55 = vadd.f32 %v448_v32, %v1623_v13  ;;  %v520_v31 = vmin.f32 %v504_v23, 10.0  ;;  %v880_v27 = vadd.f32 %v864_v40, %v2017_v3  ;;  %v2887_v23 = vld [vmem:[#allocation12_spill] sm:$0xff] }
 0x124   : > { %vm585_vm5 = vcmp.lt.f32.partialorder %v2884_v28, 3.0  ;;  %v2361_v15 = vsel %vm798_vm12, %v903_v4, %v2885_v35  ;;  %v951_v63 = vsub.f32 20.0, %v2259_v30  ;;  %v1000_v1 = vmul.f32 %v952_v20, %v952_v20  ;;  %v2891_v20 = vld [vmem:[#allocation41_spill] sm:$0xff] }
 0x125   : > { %v2373_v28 = vmul.f32 %v2101_v53, %v927_v33  ;;  %v771_v35 = vadd.f32 %v755_v59, %v2061_v45  ;;  %v902_v49 = vrot.slane %v2353_v24, 7  ;;  %v2380_v21 = vsel %vm585_vm5, 0.00012400794, %v2821_v34 }
 0x126   : > { %v998_v30 = vmul.f32 %v950_v60, %v950_v60  ;;  %v2886_v19 = vmin.f32 %v2143_v2, 10.0  ;;  %v2389_v53 = vadd.f32 %v2122_v14, %v766_v52  ;;  %v929_v45 = vadd.f32 %v2163_v10, %v881_v18  ;;  %v2892_v14 = vld [vmem:[#allocation18_spill] sm:$0xff]  ;;  %v2893_v18 = vld [vmem:[#allocation37_spill] sm:$0xff] }
 0x127   : > { %v2213_v17 = vpop.permute.xlu0 %726  ;;  %vm584_vm6 = vcmp.lt.f32.partialorder %v520_v31, 3.0  ;;  %v928_v32 = vadd.f32 %v2891_v20, %v880_v27  ;;  %v999_v59 = vmul.f32 %v951_v63, %v951_v63  ;;  %v820_v60 = vadd.f32 %v2178_v39, %v771_v35  ;;  %v2895_v27 = vld [vmem:[#allocation39_spill] sm:$0xff]  ;;  %v2903_v10 = vld [vmem:[#allocation13_spill] sm:$0xff] }
 0x128   : > { %v2224_v6 = vpop.permute.xlu1 %724  ;;  %v2226_v54 = vpop.permute.xlu2 %843  ;;  %v754_v0 = vadd.f32 %v2213_v17, %v1696_v46  ;;  %vm583_vm0 = vcmp.lt.f32.partialorder %v2886_v19, 3.0  ;;  %v2424_v39 = vsel %vm584_vm6, 0.00012400794, %v2821_v34  ;;  %v1025_v35 = vmul.f32 %v2165_v56, %v929_v45  ;;  %v2901_v56 = vld [vmem:[#allocation44_spill] sm:$0xff]  ;;  %v2902_v45 = vld [vmem:[#allocation43_spill] sm:$0xff] }
 0x129   : > { %v753_v13 = vadd.f32 %v2224_v6, %v1701_v48  ;;  %v2888_v48 = vrot.slane %v2887_v23, 1  ;;  %v2889_v6 = vld [vmem:[#allocation11_spill] sm:$0xff]  ;;  %v869_v52 = vadd.f32 %v2226_v54, %v2892_v14  ;;  %v2894_v23 = vrot.slane %v2104_v44, 7  ;;  %2896 = vst [vmem:[#allocation12_spill] sm:$0xff] %v2424_v39 }
 0x12a   : > { %v2890_v40 = vrot.slane %v2889_v6, 1  ;;  %v770_v19 = vadd.f32 %v754_v0, %v2893_v18  ;;  %v2421_v54 = vsel %vm798_vm12, %v902_v49, %v903_v4  ;;  %v2430_v0 = vmul.f32 0.1, %v998_v30 }
 0x12b   : > { %v2413_v33 = vsel %vm798_vm12, %v2894_v23, %v902_v49  ;;  %v2432_v20 = vmul.f32 0.1, %v1000_v1  ;;  %v2898_v14 = vmin.f32 %v2368_v55, 10.0  ;;  %v885_v4 = vadd.f32 %v869_v52, %v2104_v44 }
 0x12c   : > { %v446_v2 = vsel %vm445_vm4, %v2890_v40, %v2888_v48  ;;  %v2416_v48 = vsel %vm583_vm0, 0.00012400794, %v2821_v34  ;;  %v769_v40 = vadd.f32 %v753_v13, %v2895_v27  ;;  %v2899_v13 = vld [vmem:[#allocation42_spill] sm:$0xff]  ;;  %v2438_v49 = vmul.f32 0.1, %v999_v59 }
 0x12d   : > { %v2427_v63 = vadd.f32 %v446_v2, %v2889_v6  ;;  %2897 = vst [vmem:[#allocation11_spill] sm:$0xff] %v2432_v20  ;;  %vm682_vm7 = vcmp.ge.f32.partialorder %v2898_v14, 10.0  ;;  %v1024_v18 = vmul.f32 %v2899_v13, %v928_v32  ;;  %v791_v23 = vrot.slane %v2416_v48, 7  ;;  %v2442_v27 = vld [vmem:[%s1546_s7 + $0x58] sm:$0xff]  ;;  %v2914_v20 = vld [vmem:[#allocation40_spill] sm:$0xff] }
 0x12e   : > { %2900 = vst [vmem:[#allocation41_spill] sm:$0xff] %v2438_v49  ;;  %v819_v2 = vadd.f32 %v2196_v7, %v770_v19  ;;  %v2446_v30 = vmul.f32 %v2901_v56, %v820_v60  ;;  %v792_v1 = vrot.slane %v2424_v39, 7  ;;  %vm680_vm8 = vcmp.ge.f32.partialorder %v520_v31, 10.0  ;;  %v2904_v60 = vld [vmem:[#allocation14_spill] sm:$0xff] }
 0x12f   : > { %v2306_v42 = vpop.permute.xlu0 %841  ;;  %v818_v14 = vadd.f32 %v2902_v45, %v769_v40  ;;  %v2455_v52 = vsel %vm682_vm7, 0.00012400794, %v2821_v34  ;;  %v2459_v7 = vadd.f32 %v1025_v35, %v2288_v26  ;;  %v2905_v19 = vld [vmem:[#allocation22_spill] sm:$0xff]  ;;  %v933_v56 = vadd.f32 %v2202_v50, %v885_v4  ;;  %v239_v4 = vld [vmem:[%s1546_s7 + $0x50] sm:$0xff] }
 0x130   : > { %v2315_v37 = vpop.permute.xlu1 %839  ;;  %v2317_v47 = vpop.permute.xlu2 %734  ;;  %v868_v32 = vadd.f32 %v2306_v42, %v2903_v10  ;;  %v2467_v42 = vmul.f32 %v2442_v27, %v2442_v27  ;;  %v1040_v10 = vadd.f32 %v1024_v18, %v2211_v36  ;;  %v2908_v26 = vrot.slane %v2217_v16, 7  ;;  %v2913_v59 = vld [vmem:[#allocation46_spill] sm:$0xff] }
 0x131   : > { %v867_v31 = vadd.f32 %v2315_v37, %v2904_v60  ;;  %v758_v40 = vadd.f32 %v2317_v47, %v2905_v19  ;;  %v2480_v37 = vsel %vm680_vm8, 0.00012400794, %v2821_v34  ;;  %v2909_v47 = vld [vmem:[#allocation47_spill] sm:$0xff]  ;;  %v2485_v19 = vmul.f32 %v2303_v11, %v2303_v11  ;;  %v2916_v11 = vld [vmem:[#allocation45_spill] sm:$0xff] }
 0x132   : > { %2906 = vst [vmem:[#allocation18_spill] sm:$0xff] %v2467_v42  ;;  %v2477_v35 = vsel %vm798_vm12, %v2908_v26, %v791_v23  ;;  %v979_v60 = vmul.f32 %v2909_v47, %v819_v2  ;;  %v2911_v50 = vrot.slane %v2380_v21, 7  ;;  %v2496_v26 = vld [vmem:[%s1546_s7 + $0x60] sm:$0xff]  ;;  %v978_v42 = vmul.f32 %v2913_v59, %v818_v14  ;;  %v2921_v59 = vld [vmem:[#allocation16_spill] sm:$0xff] }
 0x133   : > { %2910 = vst [vmem:[#allocation39_spill] sm:$0xff] %v2485_v19  ;;  %v884_v49 = vadd.f32 %v868_v32, %v2914_v20  ;;  %v953_v2 = vsub.f32 20.0, %v239_v4  ;;  %v2915_v47 = vmin.f32 %v2427_v63, 10.0  ;;  %v883_v19 = vadd.f32 %v867_v31, %v2916_v11 }
 0x134   : > { %v2492_v18 = vsel %vm798_vm12, %v792_v1, %v2911_v50  ;;  %v774_v36 = vadd.f32 %v758_v40, %v2217_v16  ;;  %v905_v39 = vrot.slane %v2480_v37, 7  ;;  %v2917_v50 = vmin.f32 %v2262_v25, 10.0 }
 0x135   : > { %2912 = vst [vmem:[#allocation42_spill] sm:$0xff] %v2492_v18  ;;  %vm588_vm9 = vcmp.lt.f32.partialorder %v2915_v47, 3.0  ;;  %v2918_v18 = vld [vmem:[#allocation49_spill] sm:$0xff]  ;;  %v2512_v14 = vsel %vm798_vm12, %v791_v23, %v792_v1  ;;  %v2514_v20 = vmul.f32 %v239_v4, %v239_v4  ;;  %v955_v32 = vsub.f32 20.0, %v2496_v26  ;;  %v2924_v23 = vld [vmem:[#allocation38_spill] sm:$0xff] }
 0x136   : > { %vm681_vm10 = vcmp.ge.f32.partialorder %v2917_v50, 10.0  ;;  %2919 = vst [vmem:[#allocation44_spill] sm:$0xff] %v2512_v14  ;;  %v2520_v16 = vsel %vm588_vm9, 0.00012400794, %v2821_v34  ;;  %v2922_v25 = vrot.slane %v2889_v6, 1  ;;  %v2923_v40 = vrot.slane %v1620_v12, 1 }
 0x137   : > { %v2384_v3 = vpop.permute.xlu0 %732  ;;  %2920 = vst [vmem:[#allocation43_spill] sm:$0xff] %v2514_v20  ;;  %v975_v1 = vmul.f32 %v2924_v23, %v2389_v53  ;;  %v932_v4 = vadd.f32 %v2256_v51, %v884_v49  ;;  %v1001_v11 = vmul.f32 %v953_v2, %v953_v2  ;;  %v931_v50 = vadd.f32 %v2252_v29, %v883_v19 }
 0x138   : > { %v2392_v46 = vpop.permute.xlu1 %730  ;;  %v2394_v17 = vpop.permute.xlu2 %849  ;;  %v823_v6 = vadd.f32 %v2296_v57, %v774_v36  ;;  %v796_v49 = vrot.slane %v2520_v16, 7  ;;  %v2928_v19 = vmin.f32 %v2368_v55, 10.0 }
 0x139   : > { %v756_v31 = vadd.f32 %v2392_v46, %v2921_v59  ;;  %v2533_v46 = vsel %vm681_vm10, 0.00012400794, %v2821_v34  ;;  %v2925_v59 = vld [vmem:[#allocation19_spill] sm:$0xff]  ;;  %v1039_v36 = vadd.f32 %v2373_v28, %v975_v1  ;;  %v1028_v2 = vmul.f32 %v2290_v38, %v932_v4  ;;  %v2933_v4 = vld [vmem:[#allocation17_spill] sm:$0xff] }
 0x13b   : > { %v772_v57 = vadd.f32 %v756_v31, %v2239_v58  ;;  %v1055_v55 = vadd.f32 %v1040_v10, %v1039_v36  ;;  %v1044_v10 = vadd.f32 %v1028_v2, %v2446_v30  ;;  %v2589_v36 = vld [vmem:[%s1546_s7 + $0x78] sm:$0xff] }
 0x13c   : > { %v2936_v30 = vld [vmem:[#allocation25_spill] sm:$0xff] }
 0x13d   : > { %v821_v1 = vadd.f32 %v2323_v62, %v772_v57 }
 0x13f   : > { %v2452_v44 = vpop.permute.xlu0 %847 }
 0x140   : > { %v846_v13 = vpop.permute.xlu1 %845  ;;  %v2471_v45 = vpop.permute.xlu2 %740 }
 0x141   : > { %2907 = vst [vmem:[#allocation37_spill] sm:$0xff] %v2471_v45  ;;  %v2508_v45 = vmul.f32 %v2918_v18, %v933_v56  ;;  %v447_v56 = vsel %vm445_vm4, %v2923_v40, %v2922_v25  ;;  %v1042_v18 = vadd.f32 %v2365_v43, %v978_v42  ;;  %v870_v20 = vadd.f32 %v846_v13, %v2925_v59  ;;  %v2927_v43 = vld [vmem:[#allocation15_spill] sm:$0xff]  ;;  %v2929_v40 = vld [vmem:[#allocation24_spill] sm:$0xff] }
 0x142   : > { %v2926_v25 = vrot.slane %v2267_v61, 7  ;;  %v757_v51 = vadd.f32 %v2384_v3, %v2927_v43  ;;  %v954_v42 = vsub.f32 20.0, %v2442_v27  ;;  %v507_v29 = vadd.f32 %v447_v56, %v1620_v12  ;;  %v2931_v56 = vld [vmem:[#allocation51_spill] sm:$0xff]  ;;  %v2932_v43 = vld [vmem:[#allocation48_spill] sm:$0xff] }
 0x143   : > { %v906_v13 = vrot.slane %v2533_v46, 7  ;;  %vm586_vm4 = vcmp.lt.f32.partialorder %v2928_v19, 3.0  ;;  %v872_v3 = vadd.f32 %v2394_v17, %v2929_v40  ;;  %v2557_v59 = vmul.f32 0.1, %v1001_v11  ;;  %v2934_v11 = vld [vmem:[#allocation21_spill] sm:$0xff] }
 0x144   : > { %v2542_v53 = vsel %vm798_vm12, %v2926_v25, %v905_v39  ;;  %v1003_v27 = vmul.f32 %v955_v32, %v955_v32  ;;  %v2930_v25 = vld [vmem:[#allocation50_spill] sm:$0xff]  ;;  %v2561_v58 = vmul.f32 %v2931_v56, %v823_v6  ;;  %v886_v31 = vadd.f32 %v870_v20, %v2353_v24 }
 0x145   : > { %v1027_v12 = vmul.f32 %v2930_v25, %v931_v50  ;;  %v773_v19 = vadd.f32 %v757_v51, %v2932_v43  ;;  %v1002_v28 = vmul.f32 %v954_v42, %v954_v42  ;;  %v2566_v38 = vsel %vm586_vm4, 0.00012400794, %v2821_v34  ;;  %v2939_v25 = vld [vmem:[#allocation20_spill] sm:$0xff] }
 0x146   : > { %v523_v17 = vmin.f32 %v507_v29, 10.0  ;;  %v871_v32 = vadd.f32 %v2452_v44, %v2933_v4  ;;  %v2935_v6 = vrot.slane %v2455_v52, 7  ;;  %v888_v20 = vadd.f32 %v872_v3, %v2267_v61 }
 0x147   : > { %v739_v47 = vpop.permute.xlu0 %738  ;;  %v2582_v51 = vsel %vm798_vm12, %v905_v39, %v906_v13  ;;  %v2584_v42 = vmul.f32 0.1, %v1003_v27  ;;  %v1043_v44 = vadd.f32 %v1027_v12, %v979_v60  ;;  %v794_v57 = vrot.slane %v2566_v38, 7 }
 0x148   : > { %v737_v14 = vpop.permute.xlu1 %736  ;;  %v856_v23 = vpop.permute.xlu2 %855  ;;  %v2576_v24 = vsel %vm798_vm12, %v906_v13, %v2935_v6  ;;  %v1056_v40 = vadd.f32 %v1055_v55, %v2459_v7  ;;  %v822_v61 = vadd.f32 %v2348_v41, %v773_v19  ;;  %v2594_v39 = vmul.f32 0.1, %v1002_v28  ;;  %v2950_v13 = vld [vmem:[#allocation41_spill] sm:$0xff] }
 0x149   : > { %v759_v50 = vadd.f32 %v737_v14, %v2934_v11  ;;  %v934_v14 = vadd.f32 %v2413_v33, %v886_v31  ;;  %vm2596_vm11 = vcmp.lt.f32.partialorder %v523_v17, 3.0  ;;  %v981_v33 = vmul.f32 %v2344_v9, %v821_v1  ;;  %v2944_v1 = vld [vmem:[#allocation23_spill] sm:$0xff]  ;;  %v2946_v11 = vld [vmem:[#allocation37_spill] sm:$0xff] }
 0x14a   : > { %v887_v60 = vadd.f32 %v871_v32, %v2270_v5  ;;  %v1057_v27 = vadd.f32 %v1056_v40, %v1042_v18  ;;  %v936_v7 = vadd.f32 %v2361_v15, %v888_v20  ;;  %v760_v12 = vadd.f32 %v739_v47, %v2939_v25  ;;  %v2945_v32 = vld [vmem:[#allocation28_spill] sm:$0xff] }
 0x14b   : > { %v775_v3 = vadd.f32 %v759_v50, %v2416_v48  ;;  %v2940_v41 = vmin.f32 %v2427_v63, 10.0  ;;  %v958_v31 = vsub.f32 20.0, %v2589_v36  ;;  %v1030_v55 = vmul.f32 %v2430_v0, %v934_v14  ;;  %v242_v48 = vld [vmem:[%s1546_s7 + $0x68] sm:$0xff]  ;;  %v2948_v14 = vld [vmem:[#allocation30_spill] sm:$0xff] }
 0x14c   : > { %v2943_v9 = vrot.slane %v2380_v21, 7  ;;  %v2619_v15 = vmul.f32 %v2496_v26, %v2496_v26  ;;  %v1058_v18 = vadd.f32 %v1057_v27, %v1043_v44  ;;  %v982_v63 = vmul.f32 %v2350_v8, %v822_v61  ;;  %v2947_v50 = vld [vmem:[#allocation12_spill] sm:$0xff]  ;;  %v2949_v61 = vld [vmem:[#allocation27_spill] sm:$0xff] }
 0x14d   : > { %vm2607_vm13 = vcmp.ge.f32.partialorder %v2940_v41, 10.0  ;;  %v2627_v0 = vsel %vm2596_vm11, 0.00012400794, %v2821_v34  ;;  %vm683_vm14 = vcmp.ge.f32.partialorder %v523_v17, 10.0  ;;  %v1045_v19 = vadd.f32 %v2508_v45, %v981_v33  ;;  %v2952_v41 = vld [vmem:[#allocation44_spill] sm:$0xff] }
 0x14e   : > { %v802_v5 = vsel %vm798_vm12, %v2943_v9, %v794_v57  ;;  %v935_v28 = vadd.f32 %v2421_v54, %v887_v60  ;;  %v824_v26 = vadd.f32 %v2477_v35, %v775_v3  ;;  %v761_v8 = vadd.f32 %v2946_v11, %v2945_v32  ;;  %v2951_v60 = vld [vmem:[#allocation39_spill] sm:$0xff] }
 0x14f   : > { %v854_v62 = vpop.permute.xlu0 %853  ;;  %v2636_v20 = vmul.f32 %v242_v48, %v242_v48  ;;  %v2641_v17 = vsel %vm2607_vm13, 0.00012400794, %v2821_v34  ;;  %v1046_v45 = vadd.f32 %v1030_v55, %v982_v63  ;;  %v795_v35 = vrot.slane %v2627_v0, 7  ;;  %v2956_v32 = vld [vmem:[#allocation43_spill] sm:$0xff] }
 0x150   : > { %v852_v29 = vpop.permute.xlu1 %851  ;;  %v747_v43 = vpop.permute.xlu2 %746  ;;  %v874_v4 = vadd.f32 %v854_v62, %v2944_v1  ;;  %v715_v62 = vsel %vm683_vm14, 0.00012400794, %v2821_v34  ;;  %v1059_v44 = vadd.f32 %v1058_v18, %v1044_v10  ;;  %v1031_v33 = vmul.f32 %v2950_v13, %v935_v28  ;;  %v243_v10 = vld [vmem:[%s1546_s7 + $0x70] sm:$0xff] }
 0x151   : > { %v873_v2 = vadd.f32 %v852_v29, %v2936_v30  ;;  %v875_v29 = vadd.f32 %v856_v23, %v2948_v14  ;;  %v984_v3 = vmul.f32 %v2951_v60, %v824_v26  ;;  %v2953_v23 = vld [vmem:[#allocation26_spill] sm:$0xff]  ;;  %v908_v18 = vrot.slane %v715_v62, 7 }
 0x152   : > { %v890_v27 = vadd.f32 %v874_v4, %v2533_v46  ;;  %v1060_v25 = vadd.f32 %v1059_v44, %v1045_v19  ;;  %v801_v46 = vsel %vm798_vm12, %v794_v57, %v795_v35  ;;  %v1047_v19 = vadd.f32 %v1031_v33, %v2561_v58  ;;  %v2955_v4 = vld [vmem:[#allocation42_spill] sm:$0xff]  ;;  %v2958_v58 = vld [vmem:[#allocation29_spill] sm:$0xff] }
 0x153   : > { %v889_v47 = vadd.f32 %v873_v2, %v2480_v37  ;;  %v776_v37 = vadd.f32 %v760_v12, %v2947_v50  ;;  %v956_v2 = vsub.f32 20.0, %v242_v48  ;;  %v777_v12 = vadd.f32 %v761_v8, %v2380_v21 }
 0x154   : > { %v957_v48 = vsub.f32 20.0, %v243_v10  ;;  %v1061_v63 = vadd.f32 %v1060_v25, %v1046_v45  ;;  %v909_v21 = vrot.slane %v2641_v17, 7  ;;  %v938_v26 = vadd.f32 %v2582_v51, %v890_v27 }
 0x155   : > { %v937_v40 = vadd.f32 %v2542_v53, %v889_v47  ;;  %v825_v56 = vadd.f32 %v2952_v41, %v776_v37  ;;  %v2954_v53 = vld [vmem:[#allocation11_spill] sm:$0xff]  ;;  %v891_v47 = vadd.f32 %v875_v29, %v2455_v52  ;;  %v1004_v1 = vmul.f32 %v956_v2, %v956_v2  ;;  %v2959_v29 = vld [vmem:[#allocation33_spill] sm:$0xff]  ;;  %v2961_v2 = vld [vmem:[#allocation34_spill] sm:$0xff] }
 0x156   : > { %v1032_v9 = vmul.f32 %v2954_v53, %v936_v7  ;;  %v826_v7 = vadd.f32 %v2955_v4, %v777_v12  ;;  %v1005_v44 = vmul.f32 %v957_v48, %v957_v48  ;;  %v1062_v51 = vadd.f32 %v1061_v63, %v1047_v19  ;;  %v2962_v12 = vld [vmem:[#allocation18_spill] sm:$0xff] }
 0x157   : > { %v745_v6 = vpop.permute.xlu0 %744  ;;  %v1033_v28 = vmul.f32 %v2557_v59, %v937_v40  ;;  %v985_v11 = vmul.f32 %v2956_v32, %v825_v56  ;;  %v764_v40 = vadd.f32 %v747_v43, %v2959_v29  ;;  %v912_v43 = vsel %vm798_vm12, %v908_v18, %v909_v21 }
 0x158   : > { %v743_v54 = vpop.permute.xlu1 %742  ;;  %v763_v55 = vadd.f32 %v745_v6, %v2953_v23  ;;  %v862_v50 = vpop.permute.xlu2 %861  ;;  %v2957_v6 = vrot.slane %v2455_v52, 7  ;;  %v1020_v52 = vmul.f32 0.1, %v1004_v1  ;;  %v986_v41 = vmul.f32 %v2962_v12, %v826_v7 }
 0x159   : > { %v762_v30 = vadd.f32 %v743_v54, %v2949_v61  ;;  %v1049_v14 = vadd.f32 %v1033_v28, %v985_v11  ;;  %v939_v61 = vadd.f32 %v2576_v24, %v891_v47  ;;  %v878_v13 = vadd.f32 %v862_v50, %v2961_v2 }
 0x15a   : > { %v779_v37 = vadd.f32 %v763_v55, %v2627_v0  ;;  %v913_v57 = vsel %vm798_vm12, %v2957_v6, %v908_v18  ;;  %v1034_v0 = vmul.f32 %v2594_v39, %v938_v26  ;;  %v1006_v24 = vmul.f32 %v958_v31, %v958_v31  ;;  %v2963_v55 = vld [vmem:[#allocation35_spill] sm:$0xff] }
 0x15b   : > { %v778_v34 = vadd.f32 %v762_v30, %v2566_v38  ;;  %v1048_v38 = vadd.f32 %v1032_v9, %v984_v3  ;;  %v780_v39 = vadd.f32 %v764_v40, %v2520_v16  ;;  %v1035_v56 = vmul.f32 %v2584_v42, %v939_v61 }
 0x15c   : > { %v828_v3 = vadd.f32 %v801_v46, %v779_v37  ;;  %v1021_v53 = vmul.f32 0.1, %v1005_v44  ;;  %v973_v63 = vmul.f32 %v243_v10, %v243_v10  ;;  %v2964_v47 = vrot.slane %v2963_v55, 7 }
 0x15d   : > { %v827_v8 = vadd.f32 %v802_v5, %v778_v34  ;;  %v2960_v5 = vld [vmem:[#allocation31_spill] sm:$0xff]  ;;  %v1063_v33 = vadd.f32 %v1062_v51, %v1048_v38  ;;  %v2965_v38 = vld [vmem:[#allocation32_spill] sm:$0xff]  ;;  %v1022_v4 = vmul.f32 0.1, %v1006_v24  ;;  %v974_v10 = vmul.f32 %v2589_v36, %v2589_v36 }
 0x15e   : > { %v988_v18 = vmul.f32 %v2636_v20, %v828_v3  ;;  %v911_v42 = vsel %vm798_vm12, %v909_v21, %v2964_v47 }
 0x15f   : > { %v860_v59 = vpop.permute.xlu0 %859  ;;  %v987_v60 = vmul.f32 %v2619_v15, %v827_v8  ;;  %v1064_v23 = vadd.f32 %v1063_v33, %v1049_v14  ;;  %v1050_v15 = vadd.f32 %v1034_v0, %v986_v41 }
 0x160   : > { %v858_v45 = vpop.permute.xlu1 %857  ;;  %v877_v54 = vadd.f32 %v860_v59, %v2958_v58 }
 0x161   : > { %v876_v30 = vadd.f32 %v858_v45, %v2960_v5  ;;  %v1051_v9 = vadd.f32 %v1035_v56, %v987_v60  ;;  %v1065_v1 = vadd.f32 %v1064_v23, %v1050_v15 }
 0x162   : > { %v893_v25 = vadd.f32 %v877_v54, %v2641_v17  ;;  %v800_v17 = vsel %vm798_vm12, %v795_v35, %v796_v49  ;;  %v2966_v35 = vld [vmem:[#allocation36_spill] sm:$0xff] }
 0x163   : > { %v892_v27 = vadd.f32 %v876_v30, %v715_v62  ;;  %v894_v62 = vadd.f32 %v878_v13, %v2963_v55  ;;  %v829_v46 = vadd.f32 %v800_v17, %v780_v39  ;;  %v2967_v7 = vrot.slane %v2966_v35, 7 }
 0x164   : > { %v941_v31 = vadd.f32 %v912_v43, %v893_v25  ;;  %v1066_v8 = vadd.f32 %v1065_v1, %v1051_v9 }
 0x165   : > { %v940_v34 = vadd.f32 %v913_v57, %v892_v27  ;;  %v799_v20 = vsel %vm798_vm12, %v796_v49, %v2967_v7  ;;  %v942_v32 = vadd.f32 %v911_v42, %v894_v62  ;;  %v989_v50 = vmul.f32 %v973_v63, %v829_v46 }
 0x166   : > { %v1037_v21 = vmul.f32 %v1021_v53, %v941_v31 }
 0x167   : > { %v1036_v48 = vmul.f32 %v1020_v52, %v940_v34  ;;  %v1038_v6 = vmul.f32 %v1022_v4, %v942_v32 }
 0x168   : > { %v749_v28 = vpop.permute.xlu1 %748  ;;  %v1053_v57 = vadd.f32 %v1037_v21, %v989_v50 }
 0x169   : > { %v1052_v19 = vadd.f32 %v1036_v48, %v988_v18  ;;  %v765_v26 = vadd.f32 %v749_v28, %v2965_v38 }
 0x16b   : > { %v781_v11 = vadd.f32 %v765_v26, %v2966_v35  ;;  %v1067_v59 = vadd.f32 %v1066_v8, %v1052_v19 }
 0x16d   : > { %v830_v37 = vadd.f32 %v799_v20, %v781_v11  ;;  %v1068_v22 = vadd.f32 %v1067_v59, %v1053_v57 }
 0x16f   : > { %v990_v45 = vmul.f32 %v974_v10, %v830_v37 }
 0x171   : > { %v1054_v16 = vadd.f32 %v1038_v6, %v990_v45 }
 0x173   : > { %v1069_v49 = vadd.f32 %v1068_v22, %v1054_v16 }
 0x175   : > { %v1070_v58 = vrot.slane %v1069_v49, 4 }
 0x177   : > { %v1071_v54 = vadd.f32 %v1070_v58, %v1069_v49 }
 0x179   : > { %v1072_v36 = vrot.slane %v1071_v54, 2 }
 0x17b   : > { %v1073_v44 = vadd.f32 %v1072_v36, %v1071_v54 }
 0x17d   : > { %v1074_v51 = vrot.slane %v1073_v44, 1 }
 0x17f   : > { %v1075_v14 = vadd.f32 %v1074_v51, %v1073_v44 }
 0x181   : > { %1076 = vst [vmem:[%s226_s16] sm:$0x1] %v1075_v14 }
 0x182   : > { %1371 = shalt.err (!%p1368_p13)
}
 0x183   : > { %1216 = dma.vmem_to_hbm [thread:$0]  (%p1503_p9), %s1090_s18, 16, %s1092_s20, %s1078_s28  }
 0x184 PF: > { %s1103_s3 = sand.u32 1, %s1410_s9   ;;  %p1226_p0 = pnand %p1198_p12, %p1510_p11 }
 0x185   : > { %s1104_s25 = scalar_lea.sflag [#allocation4], %s1103_s3 }
 0x186   : > { %p1227_p1 = pneg %p1226_p0 }
 0x188   : > { %1405 = dma.done.wait (%p1227_p1), %s1104_s25, 16  }
 0x189   : > { %1407 = vsyncadd (%p1227_p1), %s1104_s25, 4294967280  ;;  %s21_s14 = sadd.s32 1, %s1430_s14   ;;  %s2968_s9 = smov %s1414_s10 }
 0x18a   : > { %p18_p2 = scmp.ge.s32.totalorder %s21_s14, 4   ;;  %s2969_s10 = smov %s1418_s11 }
 0x18b   : > { %s2970_s11 = smov %s1508_s23  ;;  %s2971_s12 = smov %s1426_s13 }
 0x18c   : > { %s2972_s13 = smov %s2974_s17  ;;  %20 = sbr.rel (!%p18_p2) target bundleno = 8 (0x8), region = 86 }
 0x191   :  { %1109 = vsyncpa [#allocation3], 1 }
 0x192   :  { %1111 = vsyncpa [#allocation3 + $0x1], 1 }
 0x193   :  { %1112 = vsyncpa [#allocation6], 1 }
 0x194   :  { %1114 = vsyncpa [#allocation6 + $0x1], 1 }
 0x195   :  { %1115 = vsyncpa [#allocation4], 1 }
 0x196   :  { %1117 = vsyncpa [#allocation4 + $0x1], 1 }

</bundles_post_ra>
